<compile_context>
chip_gen: v7x
topology: tpu7x:2x2x1
jax: 0.10.0
libtpu: 0.0.40
codegen_flags: <defaults>
</compile_context>

<pallas_src>
import math
import functools

import jax
import jax.numpy as jnp
from jax.experimental import pallas as pl
from jax.experimental.pallas import tpu as pltpu


# ----------------------------- kernel helpers ------------------------------ #

def _layernorm(x, w, b, eps=1e-5):
    # x: (S, E), w/b: (1, E) -- biased variance, matches torch.nn.LayerNorm
    mean = jnp.mean(x, axis=-1, keepdims=True)
    var = jnp.mean(jnp.square(x - mean), axis=-1, keepdims=True)
    return (x - mean) * jax.lax.rsqrt(var + eps) * w + b


# ------------------------------ Pallas kernel ------------------------------ #

def encoder_layer_kernel(emb_ref, zmask_ref, bias_ref,
                         ew_ref, eb_ref,
                         win_ref, bin_ref, wo_ref, bo_ref,
                         ln1w_ref, ln1b_ref,
                         w1_ref, b1_ref, w2_ref, b2_ref,
                         ln2w_ref, ln2b_ref,
                         o_ref, x_scratch, *, num_heads, head_dim):
    """One encoder layer for one batch element (grid = (B, L), L innermost).

    emb_ref:   (1, S, E)   summed token + position embeddings (f32)
    zmask_ref: (1, S, 1)   1.0 where token == padding_idx
    bias_ref:  (1, 1, S)   additive key bias (-1e30 at padded keys, else 0)
    ew/eb:     (1, E)      emb_layer_norm weight / bias
    win: (1, E, 3E) bf16   bin: (1, 1, 3E) f32     fused in_proj (scale folded in)
    wo:  (1, E, E)  bf16   bo:  (1, 1, E)  f32     out_proj
    ln1w/ln1b, ln2w/ln2b: (1, 1, E) f32
    w1: (1, E, F) bf16  b1: (1, 1, F) f32  w2: (1, F, E) bf16  b2: (1, 1, E) f32
    x_scratch: (S, E) f32  activation carried across the layer axis
    """
    l = pl.program_id(1)

    # Layer 0 epilogue: embedding LayerNorm, dropout(identity), zero padded tokens.
    @pl.when(l == 0)
    def _():
        emb = emb_ref[0]                                           # (S, E)
        zm = zmask_ref[0]                                          # (S, 1)
        x_scratch[...] = _layernorm(emb, ew_ref[...], eb_ref[...]) * (1.0 - zm)

    x = x_scratch[...]                                             # (S, E) f32
    S, E = x.shape
    H, d = num_heads, head_dim
    bias = bias_ref[0]                                             # (1, S)

    # ---- multi-head self-attention (heads batched) ----
    qkv = jnp.dot(x.astype(jnp.bfloat16), win_ref[0],
                  preferred_element_type=jnp.float32) + bin_ref[0]  # (S, 3E) f32
    qkvb = qkv.astype(jnp.bfloat16)
    q = jnp.transpose(qkvb[:, 0:E].reshape(S, H, d), (1, 0, 2))     # (H, S, d)
    k = jnp.transpose(qkvb[:, E:2 * E].reshape(S, H, d), (1, 0, 2))
    v = jnp.transpose(qkvb[:, 2 * E:3 * E].reshape(S, H, d), (1, 0, 2))

    s = jnp.einsum('hqd,hkd->hqk', q, k,
                   preferred_element_type=jnp.float32) + bias       # (H, S, S) f32
    m = jnp.max(s, axis=-1, keepdims=True)
    p = jnp.exp(s - m)
    denom = jnp.sum(p, axis=-1, keepdims=True)
    p = p * pl.reciprocal(denom, approx=True)                       # softmax over keys
    ctx = jnp.einsum('hqk,hkd->hqd', p.astype(jnp.bfloat16), v,
                     preferred_element_type=jnp.float32)            # (H, S, d)
    ctx = jnp.transpose(ctx, (1, 0, 2)).reshape(S, E)               # (S, E)

    attn = jnp.dot(ctx.astype(jnp.bfloat16), wo_ref[0],
                   preferred_element_type=jnp.float32) + bo_ref[0]  # (S, E)

    # residual + LayerNorm (dropout identity in eval)
    x = _layernorm(x + attn, ln1w_ref[0], ln1b_ref[0])

    # ---- feed-forward: fc1 -> relu -> fc2 ----
    h1 = jnp.maximum(jnp.dot(x.astype(jnp.bfloat16), w1_ref[0],
                             preferred_element_type=jnp.float32) + b1_ref[0], 0.0)
    h2 = jnp.dot(h1.astype(jnp.bfloat16), w2_ref[0],
                 preferred_element_type=jnp.float32) + b2_ref[0]
    x = _layernorm(x + h2, ln2w_ref[0], ln2b_ref[0])

    x_scratch[...] = x

    @pl.when(l == pl.num_programs(1) - 1)
    def _():
        o_ref[0] = x.astype(o_ref.dtype)


# ------------------------------ pallas wrapper ------------------------------ #

def encoder_forward(prepared, inputs, cfg):
    """inputs: (B, S) int32 token ids. Returns (B, S, E) float32."""
    pad = cfg["padding_idx"]
    B, S = inputs.shape
    E = prepared["tok_emb"].shape[1]
    L = prepared["win"].shape[0]
    F = prepared["w1"].shape[2]
    H = cfg["heads"]

    pad_mask = (inputs == pad)
    zmask = pad_mask.astype(jnp.float32).reshape(B, S, 1)
    # additive key-padding bias (finite -> no NaN for fully padded rows)
    kbias = jnp.where(pad_mask, -1e30, 0.0).astype(jnp.float32).reshape(B, 1, S)

    # PositionEmbedding: positions = arange(S) * (inputs != pad) + pad + 1
    ne = (inputs != pad).astype(jnp.int32)
    positions = jnp.arange(S, dtype=jnp.int32)[None, :] * ne + pad + 1

    # Embedding gathers (glue; data-dependent gather stays in plain JAX).
    embeds = (jnp.take(prepared["tok_emb"], inputs, axis=0)
              + jnp.take(prepared["pos_emb"], positions, axis=0)).astype(jnp.float32)

    # per-batch-element inputs (constant across the layer axis)
    batch_specs = [
        pl.BlockSpec((1, S, E), lambda b, l: (b, 0, 0)),
        pl.BlockSpec((1, S, 1), lambda b, l: (b, 0, 0)),
        pl.BlockSpec((1, 1, S), lambda b, l: (b, 0, 0)),
    ]
    # constant (grid-invariant) emb LayerNorm params
    const_specs = [
        pl.BlockSpec((1, E), lambda b, l: (0, 0)),
        pl.BlockSpec((1, E), lambda b, l: (0, 0)),
    ]
    weight_keys = ("win", "bin_", "wo", "bo", "ln1w", "ln1b",
                   "w1", "b1", "w2", "b2", "ln2w", "ln2b")
    weights = [prepared[k] for k in weight_keys]
    # per-layer streamed weights: indexed by l -> Pallas auto double-buffers them
    layer_specs = [pl.BlockSpec((1,) + w.shape[1:], lambda b, l: (l, 0, 0))
                   for w in weights]

    # explicit VMEM budget: ~2x (double-buffered) single-layer weights +
    # activations/temporaries + margin; portable across v5e/v6e (128 MiB) and
    # v7x (64 MiB physical, 32 MiB default scoped).
    per_layer_w = (E * 3 * E + E * E + 2 * E * F) * 2 + (9 * E + F) * 4
    act = (S * E * 4) * 8 + (H * S * S * 4) * 3 + (S * F * 4) * 2 + (S * 3 * E * 4) * 2
    vmem_bytes = int(2 * per_layer_w + act + (8 << 20))
    vmem_bytes = min(max(vmem_bytes, 32 << 20), 60 << 20)

    kernel = functools.partial(encoder_layer_kernel, num_heads=H, head_dim=E // H)

    return pl.pallas_call(
        kernel,
        grid_spec=pltpu.PrefetchScalarGridSpec(
            num_scalar_prefetch=0,
            grid=(B, L),                       # L innermost: weight streaming axis
            in_specs=batch_specs + const_specs + layer_specs,
            out_specs=pl.BlockSpec((1, S, E), lambda b, l: (b, 0, 0)),
            scratch_shapes=[pltpu.VMEM((S, E), jnp.float32)],
        ),
        out_shape=jax.ShapeDtypeStruct((B, S, E), jnp.float32),
        compiler_params=pltpu.CompilerParams(
            dimension_semantics=("parallel", "arbitrary"),  # batch over TCs (v7x)
            vmem_limit_bytes=vmem_bytes),
    )(embeds, zmask, kbias,
      prepared["emb_ln_w"], prepared["emb_ln_b"], *weights)


# --------------------------- parameters & prepare --------------------------- #

def init_params(key, cfg):
    V, E, F, L = cfg["vocab_size"], cfg["embed_dim"], cfg["ffn_dim"], cfg["layers"]
    pad, max_pos = cfg["padding_idx"], cfg["max_positions"]
    keys = jax.random.split(key, 2 + L)

    tok = 0.02 * jax.random.normal(keys[0], (V, E), jnp.float32)
    tok = tok.at[pad].set(0.0)                                  # padding_idx row = 0

    pos = 0.02 * jax.random.normal(keys[1], (max_pos + pad + 1, E), jnp.float32)
    pos = pos.at[pad].set(0.0)

    layers = []
    for li in range(L):
        ks = jax.random.split(keys[2 + li], 8)
        layers.append(dict(
            in_proj_w=0.02 * jax.random.normal(ks[0], (3 * E, E), jnp.float32),
            in_proj_b=0.02 * jax.random.normal(ks[1], (3 * E,), jnp.float32),
            out_proj_w=0.02 * jax.random.normal(ks[2], (E, E), jnp.float32),
            out_proj_b=0.02 * jax.random.normal(ks[3], (E,), jnp.float32),
            ln1_w=jnp.ones((E,), jnp.float32), ln1_b=jnp.zeros((E,), jnp.float32),
            fc1_w=0.02 * jax.random.normal(ks[4], (F, E), jnp.float32),
            fc1_b=0.02 * jax.random.normal(ks[5], (F,), jnp.float32),
            fc2_w=0.02 * jax.random.normal(ks[6], (E, F), jnp.float32),
            fc2_b=0.02 * jax.random.normal(ks[7], (E,), jnp.float32),
            ln2_w=jnp.ones((E,), jnp.float32), ln2_b=jnp.zeros((E,), jnp.float32),
        ))

    return dict(tok_emb=tok, pos_emb=pos,
                emb_ln_w=jnp.ones((E,), jnp.float32),
                emb_ln_b=jnp.zeros((E,), jnp.float32),
                layers=layers)


def prepare_params(params, cfg):
    """One-time weight prep (hoisted out of the forward pass):
    - stack per-layer weights along a leading L axis (streamed via the L grid axis)
    - transpose matmul weights to (in, out) layout so kernels use plain jnp.dot
    - cast matmul weights to bf16 (biases / LN params stay f32)
    - fold 1/sqrt(head_dim) into the Q columns of in_proj weight + bias
    """
    E = params["tok_emb"].shape[1]
    F = params["layers"][0]["fc1_w"].shape[0]
    d = E // cfg["heads"]
    scale = 1.0 / math.sqrt(d)

    def stack(fn):
        return jnp.stack([fn(lp) for lp in params["layers"]])

    def prep_win(lp):                       # (3E, E) torch layout -> (E, 3E)
        w = lp["in_proj_w"].T
        return w.at[:, 0:E].multiply(scale).astype(jnp.bfloat16)

    def prep_bin(lp):
        b = lp["in_proj_b"].at[0:E].multiply(scale)
        return b.reshape(1, 3 * E).astype(jnp.float32)

    return dict(
        tok_emb=params["tok_emb"], pos_emb=params["pos_emb"],
        emb_ln_w=params["emb_ln_w"].reshape(1, E),
        emb_ln_b=params["emb_ln_b"].reshape(1, E),
        win=stack(prep_win),                                           # (L, E, 3E) bf16
        bin_=stack(prep_bin),                                          # (L, 1, 3E) f32
        wo=stack(lambda lp: lp["out_proj_w"].T.astype(jnp.bfloat16)),  # (L, E, E)
        bo=stack(lambda lp: lp["out_proj_b"].reshape(1, E)),
        ln1w=stack(lambda lp: lp["ln1_w"].reshape(1, E)),
        ln1b=stack(lambda lp: lp["ln1_b"].reshape(1, E)),
        w1=stack(lambda lp: lp["fc1_w"].T.astype(jnp.bfloat16)),       # (L, E, F)
        b1=stack(lambda lp: lp["fc1_b"].reshape(1, F)),
        w2=stack(lambda lp: lp["fc2_w"].T.astype(jnp.bfloat16)),       # (L, F, E)
        b2=stack(lambda lp: lp["fc2_b"].reshape(1, E)),
        ln2w=stack(lambda lp: lp["ln2_w"].reshape(1, E)),
        ln2b=stack(lambda lp: lp["ln2_b"].reshape(1, E)),
    )


# ----------------------------------- main ----------------------------------- #

if __name__ == "__main__":
    cfg = dict(vocab_size=32, embed_dim=32, heads=4, ffn_dim=64,
               layers=2, padding_idx=1, max_positions=16)

    key = jax.random.PRNGKey(0)
    pkey, dkey = jax.random.split(key)
    params = init_params(pkey, cfg)
    prepared = prepare_params(params, cfg)      # one-time weight prep

    B, S = 2, 8
    tokens = jax.random.randint(dkey, (B, S), 2, cfg["vocab_size"], dtype=jnp.int32)
    tokens = tokens.at[1, 6:].set(cfg["padding_idx"])   # exercise key_padding_mask

    fwd = jax.jit(lambda toks: encoder_forward(prepared, toks, cfg))
    out = fwd(tokens)
    out = jax.block_until_ready(out)

    assert out.shape == (B, S, cfg["embed_dim"])
    assert bool(jnp.all(jnp.isfinite(out)))
    print("KERNEL_OK")
</pallas_src>

<mosaic_0001>
module attributes {stable_mosaic.version = 11 : i64} {
  func.func @encoder_layer_kernel(%arg0: i32, %arg1: i32, %arg2: memref<1x8x32xf32, #tpu.memory_space<vmem>>, %arg3: memref<1x8x1xf32, #tpu.memory_space<vmem>>, %arg4: memref<1x1x8xf32, #tpu.memory_space<vmem>>, %arg5: memref<1x32xf32, #tpu.memory_space<vmem>>, %arg6: memref<1x32xf32, #tpu.memory_space<vmem>>, %arg7: memref<1x32x96xbf16, #tpu.memory_space<vmem>>, %arg8: memref<1x1x96xf32, #tpu.memory_space<vmem>>, %arg9: memref<1x32x32xbf16, #tpu.memory_space<vmem>>, %arg10: memref<1x1x32xf32, #tpu.memory_space<vmem>>, %arg11: memref<1x1x32xf32, #tpu.memory_space<vmem>>, %arg12: memref<1x1x32xf32, #tpu.memory_space<vmem>>, %arg13: memref<1x32x64xbf16, #tpu.memory_space<vmem>>, %arg14: memref<1x1x64xf32, #tpu.memory_space<vmem>>, %arg15: memref<1x64x32xbf16, #tpu.memory_space<vmem>>, %arg16: memref<1x1x32xf32, #tpu.memory_space<vmem>>, %arg17: memref<1x1x32xf32, #tpu.memory_space<vmem>>, %arg18: memref<1x1x32xf32, #tpu.memory_space<vmem>>, %arg19: memref<1x8x32xf32, #tpu.memory_space<vmem>>, %arg20: memref<8x32xf32, #tpu.memory_space<vmem>>) attributes {dimension_semantics = [#tpu.dimension_semantics<parallel>, #tpu.dimension_semantics<arbitrary>], iteration_bounds = array<i64: 2, 2>, scalar_prefetch = 0 : i64, scratch_operands = 1 : i64, tpu.core_type = #tpu.core_type<tc>, window_params = [{transform_indices = @transform_0, window_bounds = array<i64: 1, 8, 32>}, {transform_indices = @transform_1, window_bounds = array<i64: 1, 8, 1>}, {transform_indices = @transform_2, window_bounds = array<i64: 1, 1, 8>}, {pipeline_mode = #tpu.pipeline_mode<synchronous>, transform_indices = @transform_3, window_bounds = array<i64: 1, 32>}, {pipeline_mode = #tpu.pipeline_mode<synchronous>, transform_indices = @transform_4, window_bounds = array<i64: 1, 32>}, {transform_indices = @transform_5, window_bounds = array<i64: 1, 32, 96>}, {transform_indices = @transform_6, window_bounds = array<i64: 1, 1, 96>}, {transform_indices = @transform_7, window_bounds = array<i64: 1, 32, 32>}, {transform_indices = @transform_8, window_bounds = array<i64: 1, 1, 32>}, {transform_indices = @transform_9, window_bounds = array<i64: 1, 1, 32>}, {transform_indices = @transform_10, window_bounds = array<i64: 1, 1, 32>}, {transform_indices = @transform_11, window_bounds = array<i64: 1, 32, 64>}, {transform_indices = @transform_12, window_bounds = array<i64: 1, 1, 64>}, {transform_indices = @transform_13, window_bounds = array<i64: 1, 64, 32>}, {transform_indices = @transform_14, window_bounds = array<i64: 1, 1, 32>}, {transform_indices = @transform_15, window_bounds = array<i64: 1, 1, 32>}, {transform_indices = @transform_16, window_bounds = array<i64: 1, 1, 32>}, {transform_indices = @transform_17, window_bounds = array<i64: 1, 8, 32>}]} {
    %c0_i32 = arith.constant 0 : i32
    %0 = arith.cmpi eq, %arg1, %c0_i32 : i32
    %1 = arith.extui %0 : i1 to i32
    %c0_i32_0 = arith.constant 0 : i32
    %2 = arith.cmpi ne, %1, %c0_i32_0 : i32
    scf.if %2 {
      %c0_62 = arith.constant 0 : index
      %c0_63 = arith.constant 0 : index
      %c0_64 = arith.constant 0 : index
      %126 = vector.load %arg2[%c0_62, %c0_63, %c0_64] : memref<1x8x32xf32, #tpu.memory_space<vmem>>, vector<1x8x32xf32>
      %127 = vector.shape_cast %126 : vector<1x8x32xf32> to vector<8x32xf32>
      %c0_65 = arith.constant 0 : index
      %c0_66 = arith.constant 0 : index
      %c0_67 = arith.constant 0 : index
      %128 = vector.load %arg3[%c0_65, %c0_66, %c0_67] : memref<1x8x1xf32, #tpu.memory_space<vmem>>, vector<1x8x1xf32>
      %129 = vector.shape_cast %128 : vector<1x8x1xf32> to vector<8x1xf32>
      %c0_68 = arith.constant 0 : index
      %c0_69 = arith.constant 0 : index
      %130 = vector.load %arg5[%c0_68, %c0_69] : memref<1x32xf32, #tpu.memory_space<vmem>>, vector<1x32xf32>
      %c0_70 = arith.constant 0 : index
      %c0_71 = arith.constant 0 : index
      %131 = vector.load %arg6[%c0_70, %c0_71] : memref<1x32xf32, #tpu.memory_space<vmem>>, vector<1x32xf32>
      %cst_72 = arith.constant dense<0.000000e+00> : vector<8xf32>
      %132 = vector.multi_reduction <add>, %127, %cst_72 [1] : vector<8x32xf32> to vector<8xf32>
      %133 = vector.shape_cast %132 : vector<8xf32> to vector<8x1xf32>
      %cst_73 = arith.constant 3.200000e+01 : f32
      %134 = vector.broadcast %cst_73 : f32 to vector<8x1xf32>
      %135 = arith.divf %133, %134 : vector<8x1xf32>
      %136 = vector.broadcast %135 : vector<8x1xf32> to vector<8x32xf32>
      %137 = arith.subf %127, %136 : vector<8x32xf32>
      %138 = arith.mulf %137, %137 : vector<8x32xf32>
      %cst_74 = arith.constant dense<0.000000e+00> : vector<8xf32>
      %139 = vector.multi_reduction <add>, %138, %cst_74 [1] : vector<8x32xf32> to vector<8xf32>
      %140 = vector.shape_cast %139 : vector<8xf32> to vector<8x1xf32>
      %cst_75 = arith.constant 3.200000e+01 : f32
      %141 = vector.broadcast %cst_75 : f32 to vector<8x1xf32>
      %142 = arith.divf %140, %141 : vector<8x1xf32>
      %143 = vector.broadcast %135 : vector<8x1xf32> to vector<8x32xf32>
      %144 = arith.subf %127, %143 : vector<8x32xf32>
      %cst_76 = arith.constant 9.99999974E-6 : f32
      %145 = vector.broadcast %cst_76 : f32 to vector<8x1xf32>
      %146 = arith.addf %142, %145 : vector<8x1xf32>
      %147 = math.rsqrt %146 : vector<8x1xf32>
      %148 = vector.broadcast %147 : vector<8x1xf32> to vector<8x32xf32>
      %149 = arith.mulf %144, %148 : vector<8x32xf32>
      %150 = vector.broadcast %130 : vector<1x32xf32> to vector<8x32xf32>
      %151 = arith.mulf %149, %150 : vector<8x32xf32>
      %152 = vector.broadcast %131 : vector<1x32xf32> to vector<8x32xf32>
      %153 = arith.addf %151, %152 : vector<8x32xf32>
      %cst_77 = arith.constant 1.000000e+00 : f32
      %154 = vector.broadcast %cst_77 : f32 to vector<8x1xf32>
      %155 = arith.subf %154, %129 : vector<8x1xf32>
      %156 = vector.broadcast %155 : vector<8x1xf32> to vector<8x32xf32>
      %157 = arith.mulf %153, %156 : vector<8x32xf32>
      %c0_78 = arith.constant 0 : index
      %c0_79 = arith.constant 0 : index
      %158 = vector.load %arg20[%c0_78, %c0_79] : memref<8x32xf32, #tpu.memory_space<vmem>>, vector<8x32xf32>
      tpu.vector_store %arg20[%c0_78, %c0_79], %157 {strides = array<i32>} : memref<8x32xf32, #tpu.memory_space<vmem>>, vector<8x32xf32>,
    } else {
    }
    %c0 = arith.constant 0 : index
    %c0_1 = arith.constant 0 : index
    %3 = vector.load %arg20[%c0, %c0_1] : memref<8x32xf32, #tpu.memory_space<vmem>>, vector<8x32xf32>
    %c0_2 = arith.constant 0 : index
    %c0_3 = arith.constant 0 : index
    %c0_4 = arith.constant 0 : index
    %4 = vector.load %arg4[%c0_2, %c0_3, %c0_4] : memref<1x1x8xf32, #tpu.memory_space<vmem>>, vector<1x1x8xf32>
    %5 = vector.shape_cast %4 : vector<1x1x8xf32> to vector<1x8xf32>
    %6 = arith.truncf %3 : vector<8x32xf32> to vector<8x32xbf16>
    %c0_5 = arith.constant 0 : index
    %c0_6 = arith.constant 0 : index
    %c0_7 = arith.constant 0 : index
    %7 = vector.load %arg7[%c0_5, %c0_6, %c0_7] : memref<1x32x96xbf16, #tpu.memory_space<vmem>>, vector<1x32x96xbf16>
    %8 = vector.shape_cast %7 : vector<1x32x96xbf16> to vector<32x96xbf16>
    %cst = arith.constant dense<0.000000e+00> : vector<8x96xf32>
    %9 = tpu.matmul %6, %8, %cst {dimension_numbers = #tpu.dot_dimension_numbers<[1], [0], [0], [1], [0, 0, 1, 1], [], []>} : vector<8x32xbf16>, vector<32x96xbf16>, vector<8x96xf32> -> vector<8x96xf32>
    %c0_8 = arith.constant 0 : index
    %c0_9 = arith.constant 0 : index
    %c0_10 = arith.constant 0 : index
    %10 = vector.load %arg8[%c0_8, %c0_9, %c0_10] : memref<1x1x96xf32, #tpu.memory_space<vmem>>, vector<1x1x96xf32>
    %11 = vector.shape_cast %10 : vector<1x1x96xf32> to vector<1x96xf32>
    %12 = vector.broadcast %11 : vector<1x96xf32> to vector<8x96xf32>
    %13 = arith.addf %9, %12 : vector<8x96xf32>
    %14 = arith.truncf %13 : vector<8x96xf32> to vector<8x96xbf16>
    %15 = vector.extract_strided_slice %14 {offsets = [0, 0], sizes = [8, 32], strides = [1, 1]} : vector<8x96xbf16> to vector<8x32xbf16>
    %16 = vector.shape_cast %15 : vector<8x32xbf16> to vector<8x4x8xbf16>
    %17 = tpu.transpose %16, [1, 0, 2] : vector<8x4x8xbf16> -> vector<4x8x8xbf16>
    %18 = vector.extract_strided_slice %14 {offsets = [0, 32], sizes = [8, 32], strides = [1, 1]} : vector<8x96xbf16> to vector<8x32xbf16>
    %19 = vector.shape_cast %18 : vector<8x32xbf16> to vector<8x4x8xbf16>
    %20 = tpu.transpose %19, [1, 0, 2] : vector<8x4x8xbf16> -> vector<4x8x8xbf16>
    %21 = vector.extract_strided_slice %14 {offsets = [0, 64], sizes = [8, 32], strides = [1, 1]} : vector<8x96xbf16> to vector<8x32xbf16>
    %22 = vector.shape_cast %21 : vector<8x32xbf16> to vector<8x4x8xbf16>
    %23 = tpu.transpose %22, [1, 0, 2] : vector<8x4x8xbf16> -> vector<4x8x8xbf16>
    "tpu.trace_start"() <{level = 10 : i32, message = "hqd,hkd->hqk"}> : () -> ()
    %cst_11 = arith.constant dense<0.000000e+00> : vector<4x8x8xf32>
    %24 = tpu.matmul %17, %20, %cst_11 {dimension_numbers = #tpu.dot_dimension_numbers<[2], [2], [1], [1], [0, 0, 0, 1, 1, 1], [0], [0]>} : vector<4x8x8xbf16>, vector<4x8x8xbf16>, vector<4x8x8xf32> -> vector<4x8x8xf32>
    "tpu.trace_stop"() : () -> ()
    %25 = vector.shape_cast %5 : vector<1x8xf32> to vector<1x1x8xf32>
    %26 = vector.broadcast %25 : vector<1x1x8xf32> to vector<4x8x8xf32>
    %27 = arith.addf %24, %26 : vector<4x8x8xf32>
    %cst_12 = arith.constant dense<0xFF800000> : vector<4x8xf32>
    %28 = vector.multi_reduction <maximumf>, %27, %cst_12 [2] : vector<4x8x8xf32> to vector<4x8xf32>
    %29 = vector.shape_cast %28 : vector<4x8xf32> to vector<4x8x1xf32>
    %30 = vector.broadcast %29 : vector<4x8x1xf32> to vector<4x8x8xf32>
    %31 = arith.subf %27, %30 : vector<4x8x8xf32>
    %32 = math.exp %31 : vector<4x8x8xf32>
    %cst_13 = arith.constant dense<0.000000e+00> : vector<4x8xf32>
    %33 = vector.multi_reduction <add>, %32, %cst_13 [2] : vector<4x8x8xf32> to vector<4x8xf32>
    %34 = vector.shape_cast %33 : vector<4x8xf32> to vector<4x8x1xf32>
    %35 = tpu.reciprocal %34 {approx = true} : vector<4x8x1xf32> -> vector<4x8x1xf32>
    %36 = vector.broadcast %35 : vector<4x8x1xf32> to vector<4x8x8xf32>
    %37 = arith.mulf %32, %36 : vector<4x8x8xf32>
    %38 = arith.truncf %37 : vector<4x8x8xf32> to vector<4x8x8xbf16>
    "tpu.trace_start"() <{level = 10 : i32, message = "hqk,hkd->hqd"}> : () -> ()
    %cst_14 = arith.constant dense<0.000000e+00> : vector<4x8x8xf32>
    %39 = tpu.matmul %38, %23, %cst_14 {dimension_numbers = #tpu.dot_dimension_numbers<[2], [1], [1], [2], [0, 0, 0, 1, 1, 2], [0], [0]>} : vector<4x8x8xbf16>, vector<4x8x8xbf16>, vector<4x8x8xf32> -> vector<4x8x8xf32>
    "tpu.trace_stop"() : () -> ()
    %40 = tpu.transpose %39, [1, 0, 2] : vector<4x8x8xf32> -> vector<8x4x8xf32>
    %41 = vector.shape_cast %40 : vector<8x4x8xf32> to vector<8x32xf32>
    %42 = arith.truncf %41 : vector<8x32xf32> to vector<8x32xbf16>
    %c0_15 = arith.constant 0 : index
    %c0_16 = arith.constant 0 : index
    %c0_17 = arith.constant 0 : index
    %43 = vector.load %arg9[%c0_15, %c0_16, %c0_17] : memref<1x32x32xbf16, #tpu.memory_space<vmem>>, vector<1x32x32xbf16>
    %44 = vector.shape_cast %43 : vector<1x32x32xbf16> to vector<32x32xbf16>
    %cst_18 = arith.constant dense<0.000000e+00> : vector<8x32xf32>
    %45 = tpu.matmul %42, %44, %cst_18 {dimension_numbers = #tpu.dot_dimension_numbers<[1], [0], [0], [1], [0, 0, 1, 1], [], []>} : vector<8x32xbf16>, vector<32x32xbf16>, vector<8x32xf32> -> vector<8x32xf32>
    %c0_19 = arith.constant 0 : index
    %c0_20 = arith.constant 0 : index
    %c0_21 = arith.constant 0 : index
    %46 = vector.load %arg10[%c0_19, %c0_20, %c0_21] : memref<1x1x32xf32, #tpu.memory_space<vmem>>, vector<1x1x32xf32>
    %47 = vector.shape_cast %46 : vector<1x1x32xf32> to vector<1x32xf32>
    %48 = vector.broadcast %47 : vector<1x32xf32> to vector<8x32xf32>
    %49 = arith.addf %45, %48 : vector<8x32xf32>
    %50 = arith.addf %3, %49 : vector<8x32xf32>
    %c0_22 = arith.constant 0 : index
    %c0_23 = arith.constant 0 : index
    %c0_24 = arith.constant 0 : index
    %51 = vector.load %arg11[%c0_22, %c0_23, %c0_24] : memref<1x1x32xf32, #tpu.memory_space<vmem>>, vector<1x1x32xf32>
    %52 = vector.shape_cast %51 : vector<1x1x32xf32> to vector<1x32xf32>
    %c0_25 = arith.constant 0 : index
    %c0_26 = arith.constant 0 : index
    %c0_27 = arith.constant 0 : index
    %53 = vector.load %arg12[%c0_25, %c0_26, %c0_27] : memref<1x1x32xf32, #tpu.memory_space<vmem>>, vector<1x1x32xf32>
    %54 = vector.shape_cast %53 : vector<1x1x32xf32> to vector<1x32xf32>
    %cst_28 = arith.constant dense<0.000000e+00> : vector<8xf32>
    %55 = vector.multi_reduction <add>, %50, %cst_28 [1] : vector<8x32xf32> to vector<8xf32>
    %56 = vector.shape_cast %55 : vector<8xf32> to vector<8x1xf32>
    %cst_29 = arith.constant 3.200000e+01 : f32
    %57 = vector.broadcast %cst_29 : f32 to vector<8x1xf32>
    %58 = arith.divf %56, %57 : vector<8x1xf32>
    %59 = vector.broadcast %58 : vector<8x1xf32> to vector<8x32xf32>
    %60 = arith.subf %50, %59 : vector<8x32xf32>
    %61 = arith.mulf %60, %60 : vector<8x32xf32>
    %cst_30 = arith.constant dense<0.000000e+00> : vector<8xf32>
    %62 = vector.multi_reduction <add>, %61, %cst_30 [1] : vector<8x32xf32> to vector<8xf32>
    %63 = vector.shape_cast %62 : vector<8xf32> to vector<8x1xf32>
    %cst_31 = arith.constant 3.200000e+01 : f32
    %64 = vector.broadcast %cst_31 : f32 to vector<8x1xf32>
    %65 = arith.divf %63, %64 : vector<8x1xf32>
    %66 = vector.broadcast %58 : vector<8x1xf32> to vector<8x32xf32>
    %67 = arith.subf %50, %66 : vector<8x32xf32>
    %cst_32 = arith.constant 9.99999974E-6 : f32
    %68 = vector.broadcast %cst_32 : f32 to vector<8x1xf32>
    %69 = arith.addf %65, %68 : vector<8x1xf32>
    %70 = math.rsqrt %69 : vector<8x1xf32>
    %71 = vector.broadcast %70 : vector<8x1xf32> to vector<8x32xf32>
    %72 = arith.mulf %67, %71 : vector<8x32xf32>
    %73 = vector.broadcast %52 : vector<1x32xf32> to vector<8x32xf32>
    %74 = arith.mulf %72, %73 : vector<8x32xf32>
    %75 = vector.broadcast %54 : vector<1x32xf32> to vector<8x32xf32>
    %76 = arith.addf %74, %75 : vector<8x32xf32>
    %77 = arith.truncf %76 : vector<8x32xf32> to vector<8x32xbf16>
    %c0_33 = arith.constant 0 : index
    %c0_34 = arith.constant 0 : index
    %c0_35 = arith.constant 0 : index
    %78 = vector.load %arg13[%c0_33, %c0_34, %c0_35] : memref<1x32x64xbf16, #tpu.memory_space<vmem>>, vector<1x32x64xbf16>
    %79 = vector.shape_cast %78 : vector<1x32x64xbf16> to vector<32x64xbf16>
    %cst_36 = arith.constant dense<0.000000e+00> : vector<8x64xf32>
    %80 = tpu.matmul %77, %79, %cst_36 {dimension_numbers = #tpu.dot_dimension_numbers<[1], [0], [0], [1], [0, 0, 1, 1], [], []>} : vector<8x32xbf16>, vector<32x64xbf16>, vector<8x64xf32> -> vector<8x64xf32>
    %c0_37 = arith.constant 0 : index
    %c0_38 = arith.constant 0 : index
    %c0_39 = arith.constant 0 : index
    %81 = vector.load %arg14[%c0_37, %c0_38, %c0_39] : memref<1x1x64xf32, #tpu.memory_space<vmem>>, vector<1x1x64xf32>
    %82 = vector.shape_cast %81 : vector<1x1x64xf32> to vector<1x64xf32>
    %83 = vector.broadcast %82 : vector<1x64xf32> to vector<8x64xf32>
    %84 = arith.addf %80, %83 : vector<8x64xf32>
    %cst_40 = arith.constant 0.000000e+00 : f32
    %85 = vector.broadcast %cst_40 : f32 to vector<8x64xf32>
    %86 = arith.maximumf %84, %85 : vector<8x64xf32>
    %87 = arith.truncf %86 : vector<8x64xf32> to vector<8x64xbf16>
    %c0_41 = arith.constant 0 : index
    %c0_42 = arith.constant 0 : index
    %c0_43 = arith.constant 0 : index
    %88 = vector.load %arg15[%c0_41, %c0_42, %c0_43] : memref<1x64x32xbf16, #tpu.memory_space<vmem>>, vector<1x64x32xbf16>
    %89 = vector.shape_cast %88 : vector<1x64x32xbf16> to vector<64x32xbf16>
    %cst_44 = arith.constant dense<0.000000e+00> : vector<8x32xf32>
    %90 = tpu.matmul %87, %89, %cst_44 {dimension_numbers = #tpu.dot_dimension_numbers<[1], [0], [0], [1], [0, 0, 1, 1], [], []>} : vector<8x64xbf16>, vector<64x32xbf16>, vector<8x32xf32> -> vector<8x32xf32>
    %c0_45 = arith.constant 0 : index
    %c0_46 = arith.constant 0 : index
    %c0_47 = arith.constant 0 : index
    %91 = vector.load %arg16[%c0_45, %c0_46, %c0_47] : memref<1x1x32xf32, #tpu.memory_space<vmem>>, vector<1x1x32xf32>
    %92 = vector.shape_cast %91 : vector<1x1x32xf32> to vector<1x32xf32>
    %93 = vector.broadcast %92 : vector<1x32xf32> to vector<8x32xf32>
    %94 = arith.addf %90, %93 : vector<8x32xf32>
    %95 = arith.addf %76, %94 : vector<8x32xf32>
    %c0_48 = arith.constant 0 : index
    %c0_49 = arith.constant 0 : index
    %c0_50 = arith.constant 0 : index
    %96 = vector.load %arg17[%c0_48, %c0_49, %c0_50] : memref<1x1x32xf32, #tpu.memory_space<vmem>>, vector<1x1x32xf32>
    %97 = vector.shape_cast %96 : vector<1x1x32xf32> to vector<1x32xf32>
    %c0_51 = arith.constant 0 : index
    %c0_52 = arith.constant 0 : index
    %c0_53 = arith.constant 0 : index
    %98 = vector.load %arg18[%c0_51, %c0_52, %c0_53] : memref<1x1x32xf32, #tpu.memory_space<vmem>>, vector<1x1x32xf32>
    %99 = vector.shape_cast %98 : vector<1x1x32xf32> to vector<1x32xf32>
    %cst_54 = arith.constant dense<0.000000e+00> : vector<8xf32>
    %100 = vector.multi_reduction <add>, %95, %cst_54 [1] : vector<8x32xf32> to vector<8xf32>
    %101 = vector.shape_cast %100 : vector<8xf32> to vector<8x1xf32>
    %cst_55 = arith.constant 3.200000e+01 : f32
    %102 = vector.broadcast %cst_55 : f32 to vector<8x1xf32>
    %103 = arith.divf %101, %102 : vector<8x1xf32>
    %104 = vector.broadcast %103 : vector<8x1xf32> to vector<8x32xf32>
    %105 = arith.subf %95, %104 : vector<8x32xf32>
    %106 = arith.mulf %105, %105 : vector<8x32xf32>
    %cst_56 = arith.constant dense<0.000000e+00> : vector<8xf32>
    %107 = vector.multi_reduction <add>, %106, %cst_56 [1] : vector<8x32xf32> to vector<8xf32>
    %108 = vector.shape_cast %107 : vector<8xf32> to vector<8x1xf32>
    %cst_57 = arith.constant 3.200000e+01 : f32
    %109 = vector.broadcast %cst_57 : f32 to vector<8x1xf32>
    %110 = arith.divf %108, %109 : vector<8x1xf32>
    %111 = vector.broadcast %103 : vector<8x1xf32> to vector<8x32xf32>
    %112 = arith.subf %95, %111 : vector<8x32xf32>
    %cst_58 = arith.constant 9.99999974E-6 : f32
    %113 = vector.broadcast %cst_58 : f32 to vector<8x1xf32>
    %114 = arith.addf %110, %113 : vector<8x1xf32>
    %115 = math.rsqrt %114 : vector<8x1xf32>
    %116 = vector.broadcast %115 : vector<8x1xf32> to vector<8x32xf32>
    %117 = arith.mulf %112, %116 : vector<8x32xf32>
    %118 = vector.broadcast %97 : vector<1x32xf32> to vector<8x32xf32>
    %119 = arith.mulf %117, %118 : vector<8x32xf32>
    %120 = vector.broadcast %99 : vector<1x32xf32> to vector<8x32xf32>
    %121 = arith.addf %119, %120 : vector<8x32xf32>
    %c0_59 = arith.constant 0 : index
    %c0_60 = arith.constant 0 : index
    %122 = vector.load %arg20[%c0_59, %c0_60] : memref<8x32xf32, #tpu.memory_space<vmem>>, vector<8x32xf32>
    tpu.vector_store %arg20[%c0_59, %c0_60], %121 {strides = array<i32>} : memref<8x32xf32, #tpu.memory_space<vmem>>, vector<8x32xf32>,
    %c1_i32 = arith.constant 1 : i32
    %123 = arith.cmpi eq, %arg1, %c1_i32 : i32
    %124 = arith.extui %123 : i1 to i32
    %c0_i32_61 = arith.constant 0 : i32
    %125 = arith.cmpi ne, %124, %c0_i32_61 : i32
    scf.if %125 {
      %c0_62 = arith.constant 0 : index
      %c0_63 = arith.constant 0 : index
      %c0_64 = arith.constant 0 : index
      %126 = vector.load %arg19[%c0_62, %c0_63, %c0_64] : memref<1x8x32xf32, #tpu.memory_space<vmem>>, vector<1x8x32xf32>
      %127 = vector.shape_cast %126 : vector<1x8x32xf32> to vector<8x32xf32>
      %128 = vector.shape_cast %121 : vector<8x32xf32> to vector<1x8x32xf32>
      tpu.vector_store %arg19[%c0_62, %c0_63, %c0_64], %128 {strides = array<i32>} : memref<1x8x32xf32, #tpu.memory_space<vmem>>, vector<1x8x32xf32>,
    } else {
    }
    return
  }
  func.func @transform_0(%arg0: i32, %arg1: i32) -> (i32, i32, i32) {
    %c0_i32 = arith.constant 0 : i32
    %c0_i32_0 = arith.constant 0 : i32
    %c0_i32_1 = arith.constant 0 : i32
    return %arg0, %c0_i32, %c0_i32_0 : i32, i32, i32
  }
  func.func @transform_1(%arg0: i32, %arg1: i32) -> (i32, i32, i32) {
    %c0_i32 = arith.constant 0 : i32
    %c0_i32_0 = arith.constant 0 : i32
    %c0_i32_1 = arith.constant 0 : i32
    return %arg0, %c0_i32, %c0_i32_0 : i32, i32, i32
  }
  func.func @transform_2(%arg0: i32, %arg1: i32) -> (i32, i32, i32) {
    %c0_i32 = arith.constant 0 : i32
    %c0_i32_0 = arith.constant 0 : i32
    %c0_i32_1 = arith.constant 0 : i32
    return %arg0, %c0_i32, %c0_i32_0 : i32, i32, i32
  }
  func.func @transform_3(%arg0: i32, %arg1: i32) -> (i32, i32) {
    %c0_i32 = arith.constant 0 : i32
    %c0_i32_0 = arith.constant 0 : i32
    %c0_i32_1 = arith.constant 0 : i32
    return %c0_i32, %c0_i32_0 : i32, i32
  }
  func.func @transform_4(%arg0: i32, %arg1: i32) -> (i32, i32) {
    %c0_i32 = arith.constant 0 : i32
    %c0_i32_0 = arith.constant 0 : i32
    %c0_i32_1 = arith.constant 0 : i32
    return %c0_i32, %c0_i32_0 : i32, i32
  }
  func.func @transform_5(%arg0: i32, %arg1: i32) -> (i32, i32, i32) {
    %c0_i32 = arith.constant 0 : i32
    %c0_i32_0 = arith.constant 0 : i32
    %c0_i32_1 = arith.constant 0 : i32
    return %arg1, %c0_i32, %c0_i32_0 : i32, i32, i32
  }
  func.func @transform_6(%arg0: i32, %arg1: i32) -> (i32, i32, i32) {
    %c0_i32 = arith.constant 0 : i32
    %c0_i32_0 = arith.constant 0 : i32
    %c0_i32_1 = arith.constant 0 : i32
    return %arg1, %c0_i32, %c0_i32_0 : i32, i32, i32
  }
  func.func @transform_7(%arg0: i32, %arg1: i32) -> (i32, i32, i32) {
    %c0_i32 = arith.constant 0 : i32
    %c0_i32_0 = arith.constant 0 : i32
    %c0_i32_1 = arith.constant 0 : i32
    return %arg1, %c0_i32, %c0_i32_0 : i32, i32, i32
  }
  func.func @transform_8(%arg0: i32, %arg1: i32) -> (i32, i32, i32) {
    %c0_i32 = arith.constant 0 : i32
    %c0_i32_0 = arith.constant 0 : i32
    %c0_i32_1 = arith.constant 0 : i32
    return %arg1, %c0_i32, %c0_i32_0 : i32, i32, i32
  }
  func.func @transform_9(%arg0: i32, %arg1: i32) -> (i32, i32, i32) {
    %c0_i32 = arith.constant 0 : i32
    %c0_i32_0 = arith.constant 0 : i32
    %c0_i32_1 = arith.constant 0 : i32
    return %arg1, %c0_i32, %c0_i32_0 : i32, i32, i32
  }
  func.func @transform_10(%arg0: i32, %arg1: i32) -> (i32, i32, i32) {
    %c0_i32 = arith.constant 0 : i32
    %c0_i32_0 = arith.constant 0 : i32
    %c0_i32_1 = arith.constant 0 : i32
    return %arg1, %c0_i32, %c0_i32_0 : i32, i32, i32
  }
  func.func @transform_11(%arg0: i32, %arg1: i32) -> (i32, i32, i32) {
    %c0_i32 = arith.constant 0 : i32
    %c0_i32_0 = arith.constant 0 : i32
    %c0_i32_1 = arith.constant 0 : i32
    return %arg1, %c0_i32, %c0_i32_0 : i32, i32, i32
  }
  func.func @transform_12(%arg0: i32, %arg1: i32) -> (i32, i32, i32) {
    %c0_i32 = arith.constant 0 : i32
    %c0_i32_0 = arith.constant 0 : i32
    %c0_i32_1 = arith.constant 0 : i32
    return %arg1, %c0_i32, %c0_i32_0 : i32, i32, i32
  }
  func.func @transform_13(%arg0: i32, %arg1: i32) -> (i32, i32, i32) {
    %c0_i32 = arith.constant 0 : i32
    %c0_i32_0 = arith.constant 0 : i32
    %c0_i32_1 = arith.constant 0 : i32
    return %arg1, %c0_i32, %c0_i32_0 : i32, i32, i32
  }
  func.func @transform_14(%arg0: i32, %arg1: i32) -> (i32, i32, i32) {
    %c0_i32 = arith.constant 0 : i32
    %c0_i32_0 = arith.constant 0 : i32
    %c0_i32_1 = arith.constant 0 : i32
    return %arg1, %c0_i32, %c0_i32_0 : i32, i32, i32
  }
  func.func @transform_15(%arg0: i32, %arg1: i32) -> (i32, i32, i32) {
    %c0_i32 = arith.constant 0 : i32
    %c0_i32_0 = arith.constant 0 : i32
    %c0_i32_1 = arith.constant 0 : i32
    return %arg1, %c0_i32, %c0_i32_0 : i32, i32, i32
  }
  func.func @transform_16(%arg0: i32, %arg1: i32) -> (i32, i32, i32) {
    %c0_i32 = arith.constant 0 : i32
    %c0_i32_0 = arith.constant 0 : i32
    %c0_i32_1 = arith.constant 0 : i32
    return %arg1, %c0_i32, %c0_i32_0 : i32, i32, i32
  }
  func.func @transform_17(%arg0: i32, %arg1: i32) -> (i32, i32, i32) {
    %c0_i32 = arith.constant 0 : i32
    %c0_i32_0 = arith.constant 0 : i32
    %c0_i32_1 = arith.constant 0 : i32
    return %arg0, %c0_i32, %c0_i32_0 : i32, i32, i32
  }
}

</mosaic_0001>

<bundles_post_ra>
// kernel: _lambda_.1
= control target key start
LH: loop header
LB: loop body
LE: loop exit
PB: predicated region body
PF: predicated region fallthrough
CT: control target
= control target key end

     0   :  { %s3478_s0 = inlined_call_operand.vmem [shape: f32[2,8,32], index: 0, kind: input, shape index: {}]   ;;  %s3479_s1 = inlined_call_operand.vmem [shape: f32[2,8,1], index: 1, kind: input, shape index: {}]   ;;  %s3480_s2 = inlined_call_operand.vmem [shape: f32[2,1,8], index: 2, kind: input, shape index: {}]   ;;  %s3481_s3 = inlined_call_operand.vmem [shape: f32[1,32], index: 3, kind: input, shape index: {}]   ;;  %s3482_s4 = inlined_call_operand.vmem [shape: f32[1,32], index: 4, kind: input, shape index: {}]   ;;  %s3483_s5 = inlined_call_operand.vmem [shape: bf16[2,32,96], index: 5, kind: input, shape index: {}]   ;;  %s3484_s6 = inlined_call_operand.vmem [shape: f32[2,1,96], index: 6, kind: input, shape index: {}]   ;;  %s3485_s7 = inlined_call_operand.vmem [shape: bf16[2,32,32], index: 7, kind: input, shape index: {}]   ;;  %s3486_s8 = inlined_call_operand.vmem [shape: f32[2,1,32], index: 8, kind: input, shape index: {}]   ;;  %s3487_s9 = inlined_call_operand.vmem [shape: f32[2,1,32], index: 9, kind: input, shape index: {}, may-alias: {9,15}]   ;;  %s3488_s10 = inlined_call_operand.vmem [shape: f32[2,1,32], index: 10, kind: input, shape index: {}, may-alias: {10,16}]   ;;  %s3489_s11 = inlined_call_operand.vmem [shape: bf16[2,32,64], index: 11, kind: input, shape index: {}]   ;;  %s3490_s12 = inlined_call_operand.vmem [shape: f32[2,1,64], index: 12, kind: input, shape index: {}]   ;;  %s3491_s13 = inlined_call_operand.vmem [shape: bf16[2,64,32], index: 13, kind: input, shape index: {}]   ;;  %s3492_s14 = inlined_call_operand.vmem [shape: f32[2,1,32], index: 14, kind: input, shape index: {}]   ;;  %s3493_s15 = inlined_call_operand.vmem [shape: f32[2,1,32], index: 15, kind: input, shape index: {}, may-alias: {9,15}]   ;;  %s3494_s16 = inlined_call_operand.vmem [shape: f32[2,1,32], index: 16, kind: input, shape index: {}, may-alias: {10,16}]   ;;  %s3495_s17 = inlined_call_operand.hbm [shape: f32[2,8,32], index: 17, kind: output, shape index: {}]  }
   0x1   :  { %3512 = sst [smem:[#allocation20_spill]] %s3478_s0 }
   0x2   :  { %3513 = sst [smem:[#allocation21_spill]] %s3479_s1 }
   0x3   :  { %3514 = sst [smem:[#allocation22_spill]] %s3481_s3 }
   0x4   :  { %3515 = sst [smem:[#allocation23_spill]] %s3482_s4 }
   0x5   :  { %3516 = sst [smem:[#allocation24_spill]] %s3483_s5 }
   0x6   :  { %3517 = sst [smem:[#allocation25_spill]] %s3485_s7 }
   0x7   :  { %3518 = sst [smem:[#allocation26_spill]] %s3487_s9 }
   0x8   :  { %3519 = sst [smem:[#allocation27_spill]] %s3488_s10 }
   0x9   :  { %3520 = sst [smem:[#allocation28_spill]] %s3489_s11 }
   0xa   :  { %3521 = sst [smem:[#allocation29_spill]] %s3492_s14 }
   0xb   :  { %3522 = sst [smem:[#allocation30_spill]] %s3493_s15 }
   0xc   :  { %3523 = sst [smem:[#allocation31_spill]] %s3494_s16 }
   0xd   :  { %3524 = sst [smem:[#allocation32_spill]] %s3495_s17 }
   0xe   :  { %22 = vsyncpa [#allocation4], 0 }
   0xf   :  { %24 = vsyncpa [#allocation4 + $0x1], 0  ;;  %s2987_s24 = smov 0   ;;  %s2989_s25 = smov 0  }
  0x10   :  { %s2991_s26 = smov 0   ;;  %s2993_s27 = smov 0  }
  0x11   :  { %s2995_s28 = smov 0   ;;  %s2997_s29 = smov 0  }
  0x12   :  { %s2999_s0 = smov 0   ;;  %s3001_s30 = smov 0  }
  0x13 LB: > { %3525 = sst [smem:[#allocation6_spill]] %s2852_s24  ;;  %s2492_s18 = sadd.s32 4294967295, %s2880_s30   ;;  %s2880_s30 = sphi %s3001_s30, %s30_s30   ;;  %s2876_s0 = sphi %s2999_s0, %s3580_s0   ;;  %s2872_s29 = sphi %s2997_s29, %s3579_s29   ;;  %s2868_s28 = sphi %s2995_s28, %s3578_s28   ;;  %s2864_s27 = sphi %s2993_s27, %s3577_s27   ;;  %s2860_s26 = sphi %s2991_s26, %s3576_s26   ;;  %s2856_s25 = sphi %s2989_s25, %s3575_s25   ;;  %s2852_s24 = sphi %s2987_s24, %s3574_s24  }
  0x14   : > { %3526 = sst [smem:[#allocation7_spill]] %s2856_s25  ;;  %s2493_s19 = sadd.s32 4294967294, %s2880_s30  }
  0x15   : > { %3527 = sst [smem:[#allocation8_spill]] %s2860_s26  ;;  %s39_s1 = sadd.s32 1, %s2872_s29 }
  0x16   : > { %3528 = sst [smem:[#allocation9_spill]] %s2864_s27  ;;  %p40_p0 = scmp.ge.s32.totalorder %s39_s1, 2 }
  0x17   : > { %3529 = sst [smem:[#allocation10_spill]] %s2868_s28  ;;  %s42_s20 = sadd.s32 1, %s2876_s0 }
  0x18   : > { %3530 = sst [smem:[#allocation11_spill]] %s2872_s29  ;;  %p491_p1 = scmp.ne.s32.totalorder %s2860_s26, %s2856_s25 }
  0x19   : > { %3531 = sst [smem:[#allocation12_spill]] %s2876_s0  ;;  %p492_p2 = scmp.eq.s32.totalorder %s2492_s18, 3 }
  0x1a   : > { %3532 = sst [smem:[#allocation13_spill]] %s2880_s30  ;;  %s3582_s1 = smov (%p40_p0, %s39_s1), 0 }
  0x1b   : > { %3533 = sst [smem:[#allocation14_spill]] %s3582_s1  ;;  %s3584_s20 = smov (!%p40_p0, %s42_s20), %s2876_s0 }
  0x1c   : > { %p3036_p3 = por %p492_p2, %p491_p1  ;;  %p497_p4 = scmp.ne.s32.totalorder %s2856_s25, %s2852_s24 }
  0x1d   : > { %p44_p5 = scmp.ge.s32.totalorder %s3584_s20, 2  ;;  %p498_p6 = scmp.eq.s32.totalorder %s2493_s19, 3 }
  0x1e   : > { %s3534_s21 = scalar_select %p3036_p3, 1, 0 }
  0x1f   : > { %p2496_p7 = scmp.ge.s32.totalorder %s2880_s30, 1  ;;  %p622_p8 = scmp.lt.s32.totalorder %s2880_s30, 5 }
  0x20   : > { %3535 = sst [smem:[#allocation15_spill]] %s3534_s21  ;;  %s3586_s20 = smov (%p44_p5, %s3584_s20), 0 }
  0x21   : > { %3536 = sst [smem:[#allocation16_spill]] %s3586_s20  ;;  %p3046_p9 = por %p498_p6, %p497_p4 }
  0x22   : > { %p623_p10 = pnand %p2496_p7, %p622_p8  ;;  %s478_s23 = ssub.s32 %s2876_s0, %s3586_s20 }
  0x23   : > { %s3537_s22 = scalar_select %p3046_p9, 1, 0 }
  0x24   : > { %s481_s18 = sadd.s32 1, %s2860_s26  ;;  %p479_p11 = scmp.eq.s32.totalorder %s478_s23, 0 }
  0x25   : > { %3538 = sst [smem:[#allocation17_spill]] %s3537_s22  ;;  %626 = sbr.rel (%p623_p10) target bundleno = 3109 (0xc25), region = 88 }
  0x26   : > { %s3054_s1 = scalar_select %p479_p11, %s2860_s26, %s481_s18  }
  0x28   : > { %3539 = sst [smem:[#allocation18_spill]] %s3054_s1 }
  0x2c   : > { %s3500_s19 = sand.u32 1, %s2856_s25   ;;  %p724_p12 = scmp.lt.s32.totalorder %s2868_s28, 1 }
  0x2d   : > { %s3060_s29 = sshll.u32 %s3500_s19, 3  ;;  %p735_p13 = scmp.lt.s32.totalorder %s2864_s27, 1 }
  0x2e   : > { %s3064_s22 = scalar_select %p724_p12, %s2868_s28, 1 }
  0x2f   : > { %s3067_s23 = scalar_select %p735_p13, %s2864_s27, 1 }
  0x30   : > { %s2498_s18 = sshll.u32 %s3064_s22, 3  ;;  %s3540_s24 = sld [smem:[#allocation20_spill]] }
  0x31   : > { %s3541_s25 = sld [smem:[#allocation21_spill]]  ;;  %s2549_s4 = sshll.u32 %s3067_s23, 4 }
  0x32   : > { %s3542_s5 = sld [smem:[#allocation24_spill]]  ;;  %s3543_s7 = sld [smem:[#allocation25_spill]] }
  0x33   : > { %s3547_s11 = sld [smem:[#allocation28_spill]]  ;;  %s3549_s10 = sld [smem:[#allocation30_spill]] }
  0x34   : > { %s723_s19 = scalar_lea.vmem [#allocation3], %s3060_s29  ;;  %s3551_s20 = sld [smem:[#allocation9_spill]] }
  0x36   : > { %s727_s30 = scalar_lea.vmem %s3540_s24, %s2498_s18 }
  0x37   : > { %s731_s28 = scalar_lea.vmem %s3541_s25, %s2498_s18  ;;  %s3548_s18 = sld [smem:[#allocation29_spill]] }
  0x38   : > { %s3088_s0 = scalar_lea.vmem %s3542_s5, %s2549_s4  ;;  %s3093_s26 = scalar_lea.vmem %s3543_s7, %s2549_s4 }
  0x39   : > { %3544 = sst [smem:[#allocation19_spill]] %s3093_s26  ;;  %s3110_s5 = scalar_lea.vmem %s3547_s11, %s2549_s4 }
  0x3a   : > { %s764_s7 = scalar_lea.vmem %s3490_s12, %s3067_s23  ;;  %s2552_s26 = sshll.u32 %s3067_s23, 5 }
  0x3b   : > { %s3120_s17 = scalar_lea.vmem %s3491_s13, %s2552_s26  ;;  %s775_s14 = scalar_lea.vmem %s3549_s10, %s3067_s23 }
  0x3c   : > { %s3550_s11 = sld [smem:[#allocation31_spill]]  ;;  %p2508_p0 = scmp.ne.s32.totalorder %s3551_s20, 0 }
  0x3d   : > { %s772_s3 = scalar_lea.vmem %s3548_s18, %s3067_s23  ;;  %v784_v0 = vld [vmem:[%s727_s30] sm:$0xff] (!%p2508_p0)  ;;  %vm788_vm0 = vcmask (!%p2508_p0), 261120   ;;  %v2882_v3 = vmov (!%p2508_p0), 0   ;;  %s3552_s16 = sld [smem:[#allocation22_spill]] (!%p2508_p0) }
  0x3e   : > { %783 = sbr.rel (%p2508_p0) target bundleno = 378 (0x17a), region = 92  ;;  %v789_v1 = vsel (!%p2508_p0), %vm788_vm0, %v784_v0, 0.0  ;;  %v785_v2 = vld [vmem:[%s731_s28] sm:$0xff] (!%p2508_p0)  ;;  %2752 = vset.pattern.permute.xlu1 (!%p2508_p0), %v2882_v3  ;;  %2753 = vset.pattern.permute.xlu0 (!%p2508_p0), %v2882_v3  ;;  %s3553_s26 = sld [smem:[#allocation23_spill]] (!%p2508_p0) }
  0x3f   : > { %790 = vadd.xlane.f32.xlu0 (!%p2508_p0), %v789_v1  ;;  %v817_v4 = vsub.f32 (!%p2508_p0), 1.0, %v785_v2 }
  0x41   : > { %820 = vperm.xlu1 (!%p2508_p0), %2752, %v817_v4  }
  0x42   : > { %s778_s9 = scalar_lea.vmem %s3550_s11, %s3067_s23 }
  0x43   : > { %v2509_v14 = vld [vmem:[%s3552_s16] ss:$0 sm:$0xff] (!%p2508_p0) }
  0x44   : > { %v2510_v16 = vld [vmem:[%s3553_s26] ss:$0 sm:$0xff] (!%p2508_p0) }
  0xc0   : > { %v821_v18 = vpop.permute.xlu1 %820 }
  0xcc   : > { %v791_v5 = vpop.xlane.xlu0 %790 }
  0xcd   : > { %v793_v6 = vmul.f32 0.03125, %v791_v5 }
  0xcf   : > { %v794_v7 = vsub.f32 %v784_v0, %v793_v6 }
  0xd1   : > { %v795_v8 = vmul.f32 %v794_v7, %v794_v7 }
  0xd3   : > { %v796_v9 = vsel %vm788_vm0, %v795_v8, 0.0 }
  0xd4   : > { %797 = vadd.xlane.f32.xlu0 %v796_v9 }
 0x161   : > { %v798_v10 = vpop.xlane.xlu0 %797 }
 0x162   : > { %v799_v11 = vmul.f32 0.03125, %v798_v10 }
 0x164   : > { %v800_v12 = vadd.f32 1e-05, %v799_v11 }
 0x166   : > { %2754 = vrsqrt.f32 %v800_v12 }
 0x170   : > { %v2755_v13 = vpop.eup %2754 }
 0x171   : > { %v802_v15 = vmul.f32 %v2755_v13, %v794_v7 }
 0x173   : > { %v809_v17 = vmul.f32 %v2509_v14, %v802_v15 }
 0x175   : > { %v816_v19 = vadd.f32 %v2510_v16, %v809_v17 }
 0x177   : > { %v823_v20 = vmul.f32 %v821_v18, %v816_v19 }
 0x179   : > { %824 = vst.msk [vmem:[#allocation2] sm:$0xff] %vm788_vm0, %v823_v20 }
 0x17a PF: > { %v2756_v21 = vld [vmem:[%s3088_s0] sm:$0xff]   ;;  %v2883_v22 = vmov 0.0   ;;  %v2757_v23 = vld [vmem:[%s3088_s0 + $0x8] sm:$0xff]   ;;  %vm2884_vm1 = vmmov 0   ;;  %vm851_vm2 = vcmask 261120   ;;  %s3554_s24 = scalar_lea.vmem %s3484_s6, %s3067_s23  ;;  %s2885_s1 = smov 104   ;;  %v906_v38 = vlaneseq }
 0x17b   : > { %2583 = vmatprep.subr.bf16.mxu0 %v2883_v22  ;;  %2591 = vmatprep.subr.bf16.mxu1 %v2883_v22  ;;  %v2511_v26 = vld [vmem:[%s3554_s24] ss:$0 sm:$0xff]  ;;  %s2886_s25 = smov 120   ;;  %s2887_s21 = smov 96   ;;  %v2889_v36 = vmov 1983009808  }
 0x17c   : > { %2584 = vmatpush3.bf16.msra.mxu0 %v2756_v21  ;;  %2587 = vmatprep.mubr.msk.bf16.mxu0 %vm2884_vm1, %v2883_v22  ;;  %s2888_s27 = smov 112   ;;  %v904_v37 = vunpack.c.l.s4 %v2889_v36  ;;  %v907_v40 = vshrl.u32 %v906_v38, 7  ;;  %v2890_v41 = vmov 1934713408   ;;  %v2891_v60 = vmov 0   ;;  %s3555_s20 = scalar_lea.vmem %s3480_s2, %s3064_s22 }
 0x17d   : > { %2585 = vmatprep.subr.bf16.mxu0 %v2883_v22  ;;  %2593 = vmatprep.mubr.msk.bf16.mxu1 %vm2884_vm1, %v2883_v22  ;;  %v921_v42 = vunpack.c.l.s4 %v2890_v41  ;;  %vm1410_vm3 = vcmask 64512   ;;  %s2892_s22 = smov 64   ;;  %vm1646_vm4 = vcmask 1043456   ;;  %s3556_s10 = sld [smem:[#allocation19_spill]]  ;;  %vm1977_vm5 = vcmask 130048  }
 0x17e   : > { %v905_v39 = vunpack.c.0.s8 %v904_v37  ;;  %s2893_s11 = smov 16   ;;  %s2894_s16 = smov 8   ;;  %vm1979_vm6 = vcmask 195584   ;;  %vm2187_vm7 = vcmask 523264  }
 0x17f   : > { %v922_v45 = vunpack.c.0.s8 %v921_v42  ;;  %s2895_s28 = smov 24   ;;  %s3557_s0 = scalar_lea.vmem %s3486_s8, %s3067_s23 }
 0x180   : > { %v3151_v24 = vld [vmem:[#allocation2] sm:$0xff]  ;;  %2586 = vmatpush3.bf16.msra.mxu0 %v2757_v23  ;;  %v3182_v43 = vsub.s32 %v905_v39, %v907_v40  ;;  %s3558_s24 = sld [smem:[#allocation26_spill]]  ;;  %s3565_s26 = sld [smem:[#allocation9_spill]] }
 0x181   : > { %v827_v25 = vpack.c.bf16 %v3151_v24, %v3151_v24  ;;  %2597 = vmatprep.subr.bf16.mxu0 %v2883_v22  ;;  %v3192_v49 = vsub.s32 %v922_v45, %v907_v40 }
 0x183   : > { %2588 = vmatmul.mubr.msk.bf16.vlgmr.msra.gmra.mrb[0].mxu0 %vm851_vm2, %v827_v25 }
 0x184   : > { %2599 = vmatprep.mubr.msk.bf16.mxu0 %vm2884_vm1, %v2883_v22 }
 0x186   : > { %p2544_p1 = scmp.ne.s32.totalorder %s3565_s26, 1 }
 0x256   : > { %v889_v27 = vpop.f32.mrb[0].mxu0 }
 0x257   : > { %v890_v28 = vadd.f32 %v2511_v26, %v889_v27  ;;  %v2589_v29 = vpop.f32.mrb[1].mxu0 }
 0x258   : > { %v892_v30 = vpop.f32.mrb[2].mxu0 }
 0x259   : > { %v3167_v31 = vpack.c.bf16 %v890_v28, %v890_v28  ;;  %v2590_v32 = vpop.f32.mrb[3].mxu0 }
 0x25b   : > { %901 = vrot.lane.b32.xlu1 %v3167_v31, %s2885_s1  ;;  %897 = vrot.lane.b32.xlu0 %v3167_v31, %s2886_s25  ;;  %v909_v48 = vrot.slane %v3167_v31, %v3182_v43  ;;  %s3559_s1 = scalar_lea.vmem %s3558_s24, %s3067_s23 }
 0x25f   : > { %1064 = vrot.lane.b32.xlu1 %v3167_v31, %s2887_s21  ;;  %899 = vrot.lane.b32.xlu0 %v3167_v31, %s2888_s27  ;;  %s3560_s27 = sld [smem:[#allocation27_spill]] }
 0x265   : > { %s3561_s4 = scalar_lea.vmem %s3560_s27, %s3067_s23 }
 0x2cd   : > { %v3173_v33 = vpop.permute.xlu0 %897  ;;  %v3176_v34 = vpop.permute.xlu1 %901 }
 0x2ce   : > { %1066 = vrot.lane.b32.xlu0 %v3173_v33, %s2887_s21  ;;  %v951_v44 = vrot.slane %v3176_v34, %v3182_v43  ;;  %v943_v46 = vrot.slane %v3173_v33, %v3182_v43 }
 0x2d0   : > { %v952_v50 = vcombine.low %v943_v46, %v951_v44  ;;  %v953_v53 = vcombine.high %v943_v46, %v951_v44 }
 0x2d1   : > { %v3178_v35 = vpop.permute.xlu0 %899  ;;  %v1065_v59 = vpop.permute.xlu1 %1064 }
 0x2d2   : > { %1070 = vrot.lane.b32.xlu0 %v3176_v34, %s2887_s21  ;;  %1068 = vrot.lane.b32.xlu1 %v3178_v35, %s2887_s21  ;;  %v917_v47 = vrot.slane %v3178_v35, %v3182_v43  ;;  %v3195_v54 = vrot.slane %v952_v50, %v3192_v49  ;;  %v3204_v57 = vrot.slane %v953_v53, %v3192_v49 }
 0x2d3   : > { %v1079_v2 = vrot.slane %v1065_v59, %v3182_v43 }
 0x2d4   : > { %v918_v51 = vcombine.low %v909_v48, %v917_v47  ;;  %v919_v52 = vcombine.high %v909_v48, %v917_v47  ;;  %v968_v61 = vcombine.high %v3195_v54, %v2891_v60  ;;  %v969_v0 = vcombine.high %v3204_v57, %v2891_v60 }
 0x2d5   : > { %v975_v1 = vshrl.u32 %v3195_v54, 16  ;;  %v991_v5 = vshrl.u32 %v3204_v57, 16 }
 0x2d6   : > { %v3198_v55 = vrot.slane %v918_v51, %v3192_v49  ;;  %v3201_v56 = vrot.slane %v919_v52, %v3192_v49  ;;  %v983_v10 = vshrl.u32 %v968_v61, 16  ;;  %v999_v14 = vshrl.u32 %v969_v0, 16 }
 0x2d8   : > { %v934_v62 = vcombine.high %v3198_v55, %v2891_v60  ;;  %v935_v63 = vcombine.high %v3201_v56, %v2891_v60  ;;  %v974_v3 = vshrl.u32 %v3198_v55, 16  ;;  %v990_v6 = vshrl.u32 %v3201_v56, 16 }
 0x2d9   : > { %v972_v15 = vpack.i.b16 %v3195_v54, %v3198_v55  ;;  %v988_v54 = vpack.i.b16 %v3204_v57, %v3201_v56 }
 0x2da   : > { %v982_v11 = vshrl.u32 %v934_v62, 16  ;;  %v998_v12 = vshrl.u32 %v935_v63, 16  ;;  %v976_v18 = vpack.i.b16 %v975_v1, %v974_v3  ;;  %v980_v19 = vpack.i.b16 %v968_v61, %v934_v62 }
 0x2db   : > { %v992_v23 = vpack.i.b16 %v991_v5, %v990_v6  ;;  %v996_v25 = vpack.i.b16 %v969_v0, %v935_v63  ;;  %v1002_v5 = vcombine.low %v972_v15, %v988_v54 }
 0x2dc   : > { %v984_v28 = vpack.i.b16 %v983_v10, %v982_v11  ;;  %v1000_v29 = vpack.i.b16 %v999_v14, %v998_v12 }
 0x2dd   : > { %v1010_v0 = vcombine.low %v980_v19, %v996_v25  ;;  %v1027_v3 = vcombine.low %v976_v18, %v992_v23  ;;  %v1009_v14 = vrot.slane %v1002_v5, %v3182_v43 }
 0x2de   : > { %v1035_v63 = vcombine.low %v984_v28, %v1000_v29 }
 0x2df   : > { %v1017_v10 = vrot.slane %v1010_v0, %v3182_v43  ;;  %v1034_v12 = vrot.slane %v1027_v3, %v3182_v43 }
 0x2e0   : > { %v1042_v57 = vrot.slane %v1035_v63, %v3182_v43 }
 0x340   : > { %v1067_v58 = vpop.permute.xlu0 %1066 }
 0x341   : > { %v1113_v7 = vrot.slane %v1067_v58, %v3182_v43 }
 0x344   : > { %v1071_v4 = vpop.permute.xlu0 %1070  ;;  %v1069_v8 = vpop.permute.xlu1 %1068 }
 0x345   : > { %v1121_v9 = vrot.slane %v1071_v4, %v3182_v43  ;;  %v1087_v13 = vrot.slane %v1069_v8, %v3182_v43 }
 0x347   : > { %v1122_v16 = vcombine.low %v1113_v7, %v1121_v9  ;;  %v1123_v17 = vcombine.high %v1113_v7, %v1121_v9  ;;  %v1088_v20 = vcombine.low %v1079_v2, %v1087_v13  ;;  %v1089_v21 = vcombine.high %v1079_v2, %v1087_v13 }
 0x349   : > { %v1130_v26 = vrot.slane %v1122_v16, %v3192_v49  ;;  %v1137_v27 = vrot.slane %v1123_v17, %v3192_v49  ;;  %v1096_v30 = vrot.slane %v1088_v20, %v3192_v49  ;;  %v1103_v32 = vrot.slane %v1089_v21, %v3192_v49 }
 0x34a   : > { %v1043_v16 = vcombine.low %v1034_v12, %v1042_v57  ;;  %v1018_v17 = vcombine.low %v1009_v14, %v1017_v10 }
 0x34b   : > { %v1138_v36 = vcombine.high %v1130_v26, %v2891_v60  ;;  %v1139_v37 = vcombine.high %v1137_v27, %v2891_v60  ;;  %v1145_v38 = vshrl.u32 %v1130_v26, 16  ;;  %v1161_v39 = vshrl.u32 %v1137_v27, 16 }
 0x34c   : > { %v1104_v40 = vcombine.high %v1096_v30, %v2891_v60  ;;  %v1105_v41 = vcombine.high %v1103_v32, %v2891_v60  ;;  %v1144_v42 = vshrl.u32 %v1096_v30, 16  ;;  %v1160_v44 = vshrl.u32 %v1103_v32, 16 }
 0x34d   : > { %v1142_v45 = vpack.i.b16 %v1130_v26, %v1096_v30  ;;  %v1153_v46 = vshrl.u32 %v1138_v36, 16  ;;  %v1158_v47 = vpack.i.b16 %v1137_v27, %v1103_v32  ;;  %v1169_v48 = vshrl.u32 %v1139_v37, 16 }
 0x34e   : > { %v1152_v50 = vshrl.u32 %v1104_v40, 16  ;;  %v1168_v51 = vshrl.u32 %v1105_v41, 16  ;;  %v1146_v52 = vpack.i.b16 %v1145_v38, %v1144_v42  ;;  %v1150_v53 = vpack.i.b16 %v1138_v36, %v1104_v40 }
 0x34f   : > { %v1162_v55 = vpack.i.b16 %v1161_v39, %v1160_v44  ;;  %v1166_v58 = vpack.i.b16 %v1139_v37, %v1105_v41  ;;  %v1172_v59 = vcombine.low %v1142_v45, %v1158_v47  ;;  %v1050_v26 = vrot.slane %v1043_v16, %v3192_v49 }
 0x350   : > { %v1154_v61 = vpack.i.b16 %v1153_v46, %v1152_v50  ;;  %v1170_v62 = vpack.i.b16 %v1169_v48, %v1168_v51  ;;  %v1025_v29 = vrot.slane %v1018_v17, %v3192_v49 }
 0x351   : > { %v1180_v1 = vcombine.low %v1150_v53, %v1166_v58  ;;  %v1197_v2 = vcombine.low %v1146_v52, %v1162_v55  ;;  %v1179_v6 = vrot.slane %v1172_v59, %v3182_v43  ;;  %v1056_v36 = vshrl.u32 %v1050_v26, 16  ;;  %v2515_v52 = vld [vmem:[%s3555_s20] ss:$0 sm:$0xff] }
 0x352   : > { %v1205_v4 = vcombine.low %v1154_v61, %v1170_v62  ;;  %v1054_v38 = vpack.i.b16 %v1050_v26, %v1025_v29  ;;  %v1055_v39 = vshrl.u32 %v1025_v29, 16  ;;  %v1051_v44 = vcombine.high %v1050_v26, %v2891_v60 }
 0x353   : > { %v1187_v7 = vrot.slane %v1180_v1, %v3182_v43  ;;  %v1204_v8 = vrot.slane %v1197_v2, %v3182_v43  ;;  %v1026_v46 = vcombine.high %v1025_v29, %v2891_v60 }
 0x354   : > { %v1212_v56 = vrot.slane %v1205_v4, %v3182_v43  ;;  %v1057_v42 = vpack.i.b16 %v1056_v36, %v1055_v39  ;;  %v1062_v47 = vshrl.u32 %v1051_v44, 16 }
 0x355   : > { %v1188_v9 = vcombine.low %v1179_v6, %v1187_v7  ;;  %v1060_v48 = vpack.i.b16 %v1051_v44, %v1026_v46  ;;  %v1061_v50 = vshrl.u32 %v1026_v46, 16 }
 0x356   : > { %v1213_v11 = vcombine.low %v1204_v8, %v1212_v56 }
 0x357   : > { %v1195_v13 = vrot.slane %v1188_v9, %v3192_v49  ;;  %v1063_v51 = vpack.i.b16 %v1062_v47, %v1061_v50 }
 0x358   : > { %v1220_v15 = vrot.slane %v1213_v11, %v3192_v49 }
 0x359   : > { %v1225_v19 = vshrl.u32 %v1195_v13, 16  ;;  %v1196_v27 = vcombine.high %v1195_v13, %v2891_v60 }
 0x35a   : > { %v1224_v18 = vpack.i.b16 %v1220_v15, %v1195_v13  ;;  %v1226_v20 = vshrl.u32 %v1220_v15, 16  ;;  %v1221_v21 = vcombine.high %v1220_v15, %v2891_v60 }
 0x35b   : > { %v1231_v37 = vshrl.u32 %v1196_v27, 16 }
 0x35c   : > { %v1415_v23 = vsel %vm1410_vm3, %v1224_v18, 0  ;;  %v1227_v25 = vpack.i.b16 %v1226_v20, %v1225_v19  ;;  %v1232_v30 = vshrl.u32 %v1221_v21, 16  ;;  %v1230_v32 = vpack.i.b16 %v1221_v21, %v1196_v27 }
 0x35d   : > { %2592 = vmatpush3.bf16.xpose.msra.mxu1 %v1415_v23 }
 0x35e   : > { %v1461_v28 = vsel %vm1410_vm3, %v1227_v25, 0  ;;  %2603 = vmatprep.subr.bf16.mxu1 %v2883_v22  ;;  %v1233_v40 = vpack.i.b16 %v1232_v30, %v1231_v37  ;;  %v1507_v41 = vsel %vm1410_vm3, %v1230_v32, 0 }
 0x35f   : > { %2598 = vmatpush3.bf16.xpose.msra.mxu0 %v1461_v28 }
 0x360   : > { %2609 = vmatprep.subr.bf16.mxu0 %v2883_v22  ;;  %v1553_v45 = vsel %vm1410_vm3, %v1233_v40, 0 }
 0x364   : > { %2594 = vmatmul.mubr.msk.bf16.vlgmr.msra.gmra.mrb[0].mxu1 %vm1410_vm3, %v1054_v38 }
 0x365   : > { %2604 = vmatpush3.bf16.xpose.msra.mxu1 %v1507_v41  ;;  %2605 = vmatprep.mubr.msk.bf16.mxu1 %vm2884_vm1, %v2883_v22 }
 0x366   : > { %2600 = vmatmul.mubr.msk.bf16.vlgmr.msra.gmra.mrb[4].mxu0 %vm1410_vm3, %v1057_v42  ;;  %2615 = vmatprep.subr.bf16.mxu1 %v2883_v22 }
 0x367   : > { %2610 = vmatpush3.bf16.xpose.msra.mxu0 %v1553_v45  ;;  %2611 = vmatprep.mubr.msk.bf16.mxu0 %vm2884_vm1, %v2883_v22 }
 0x368   : > { %2621 = vmatprep.subr.bf16.mxu0 %v2883_v22 }
 0x36c   : > { %2606 = vmatmul.mubr.msk.bf16.vlgmr.msra.gmra.mrb[4].mxu1 %vm1410_vm3, %v1060_v48 }
 0x36d   : > { %2617 = vmatprep.mubr.msk.bf16.mxu1 %vm2884_vm1, %v2883_v22 }
 0x36e   : > { %2612 = vmatmul.mubr.msk.bf16.vlgmr.msra.gmra.mrb[8].mxu0 %vm1410_vm3, %v1063_v51 }
 0x36f   : > { %2623 = vmatprep.mubr.msk.bf16.mxu0 %vm2884_vm1, %v2883_v22 }
 0x437   : > { %v1451_v53 = vpop.f32.mrb[0].mxu1 }
 0x438   : > { %v1452_v54 = vadd.f32 %v2515_v52, %v1451_v53  ;;  %v2595_v55 = vpop.f32.mrb[1].mxu1 }
 0x439   : > { %v1454_v58 = vpop.f32.mrb[2].mxu1  ;;  %v1497_v59 = vpop.f32.mrb[4].mxu0 }
 0x43a   : > { %v1498_v61 = vadd.f32 %v2515_v52, %v1497_v59  ;;  %v2596_v62 = vpop.f32.mrb[3].mxu1  ;;  %v2601_v63 = vpop.f32.mrb[5].mxu0  ;;  %v1595_v0 = vsel %vm1410_vm3, %v1452_v54, -inf }
 0x43b   : > { %1596 = vmax.xlane.f32.xlu1 %v1595_v0  ;;  %v1500_v1 = vpop.f32.mrb[6].mxu0 }
 0x43c   : > { %v2602_v2 = vpop.f32.mrb[7].mxu0  ;;  %v1598_v3 = vsel %vm1410_vm3, %v1498_v61, -inf }
 0x43d   : > { %1599 = vmax.xlane.f32.xlu0 %v1598_v3 }
 0x43f   : > { %v1543_v4 = vpop.f32.mrb[4].mxu1 }
 0x440   : > { %v1544_v5 = vadd.f32 %v2515_v52, %v1543_v4  ;;  %v2607_v6 = vpop.f32.mrb[5].mxu1 }
 0x441   : > { %v1546_v7 = vpop.f32.mrb[6].mxu1  ;;  %v1589_v8 = vpop.f32.mrb[8].mxu0 }
 0x442   : > { %v1590_v56 = vadd.f32 %v2515_v52, %v1589_v8  ;;  %v2608_v57 = vpop.f32.mrb[7].mxu1  ;;  %v2613_v9 = vpop.f32.mrb[9].mxu0  ;;  %v1601_v10 = vsel %vm1410_vm3, %v1544_v5, -inf }
 0x443   : > { %1602 = vmax.xlane.f32.xlu0 %v1601_v10  ;;  %v1592_v11 = vpop.f32.mrb[10].mxu0 }
 0x444   : > { %v2614_v12 = vpop.f32.mrb[11].mxu0  ;;  %v1604_v13 = vsel %vm1410_vm3, %v1590_v56, -inf }
 0x445   : > { %1605 = vmax.xlane.f32.xlu1 %v1604_v13 }
 0x456   : > { %1236 = vrot.lane.b32.xlu1 %v3173_v33, %s2892_s22 }
 0x459   : > { %1234 = vrot.lane.b32.xlu0 %v3167_v31, %s2892_s22 }
 0x4c8   : > { %v1597_v14 = vpop.xlane.xlu1 %1596 }
 0x4c9   : > { %v1607_v15 = vsub.f32 %v1452_v54, %v1597_v14 }
 0x4ca   : > { %v1600_v16 = vpop.xlane.xlu0 %1599 }
 0x4cb   : > { %v1611_v17 = vmul.f32 1.442695, %v1607_v15  ;;  %v1608_v18 = vsub.f32 %v1498_v61, %v1600_v16 }
 0x4cd   : > { %2766 = vpow2.f32 %v1611_v17  ;;  %v1613_v19 = vmul.f32 1.442695, %v1608_v18 }
 0x4cf   : > { %2768 = vpow2.f32 %v1613_v19 }
 0x4d0   : > { %v1603_v25 = vpop.xlane.xlu0 %1602 }
 0x4d1   : > { %v1609_v27 = vsub.f32 %v1544_v5, %v1603_v25 }
 0x4d2   : > { %v1606_v31 = vpop.xlane.xlu1 %1605 }
 0x4d3   : > { %v1610_v26 = vsub.f32 %v1590_v56, %v1606_v31  ;;  %v1615_v29 = vmul.f32 1.442695, %v1609_v27 }
 0x4d5   : > { %v1617_v28 = vmul.f32 1.442695, %v1610_v26 }
 0x4d6   : > { %v1237_v37 = vpop.permute.xlu1 %1236 }
 0x4d7   : > { %v3281_v20 = vpop.eup %2766  ;;  %2770 = vpow2.f32 %v1617_v28  ;;  %v1283_v41 = vrot.slane %v1237_v37, %v3182_v43 }
 0x4d8   : > { %v1619_v21 = vsel %vm1410_vm3, %v3281_v20, 0.0  ;;  %2772 = vpow2.f32 %v1615_v29 }
 0x4d9   : > { %v3285_v23 = vpop.eup %2768  ;;  %1620 = vadd.xlane.f32.xlu0 %v1619_v21 }
 0x4da   : > { %v1622_v33 = vsel %vm1410_vm3, %v3285_v23, 0.0 }
 0x4db   : > { %1623 = vadd.xlane.f32.xlu1 %v1622_v33 }
 0x4e1   : > { %v3291_v30 = vpop.eup %2770 }
 0x4e2   : > { %v3293_v32 = vpop.eup %2772  ;;  %v1628_v36 = vsel %vm1410_vm3, %v3291_v30, 0.0 }
 0x4ec   : > { %1238 = vrot.lane.b32.xlu1 %v3178_v35, %s2892_s22  ;;  %v1625_v35 = vsel %vm1410_vm3, %v3293_v32, 0.0 }
 0x4ef   : > { %1240 = vrot.lane.b32.xlu0 %v3176_v34, %s2892_s22  ;;  %v1235_v34 = vpop.permute.xlu0 %1234 }
 0x4f0   : > { %v1249_v45 = vrot.slane %v1235_v34, %v3182_v43 }
 0x50e   : > { %1629 = vadd.xlane.f32.xlu0 %v1628_v36 }
 0x510   : > { %1626 = vadd.xlane.f32.xlu1 %v1625_v35 }
 0x566   : > { %v1621_v38 = vpop.xlane.xlu0 %1620 }
 0x567   : > { %2774 = vrcp.f32 %v1621_v38 }
 0x568   : > { %v1624_v39 = vpop.xlane.xlu1 %1623 }
 0x569   : > { %2776 = vrcp.f32 %v1624_v39 }
 0x56a   : > { %v1241_v40 = vpop.permute.xlu0 %1240 }
 0x56b   : > { %v1291_v42 = vrot.slane %v1241_v40, %v3182_v43 }
 0x56c   : > { %v1239_v44 = vpop.permute.xlu1 %1238 }
 0x56d   : > { %v1292_v46 = vcombine.low %v1283_v41, %v1291_v42  ;;  %v1293_v47 = vcombine.high %v1283_v41, %v1291_v42  ;;  %v1257_v48 = vrot.slane %v1239_v44, %v3182_v43 }
 0x56f   : > { %v1300_v50 = vrot.slane %v1292_v46, %v3192_v49  ;;  %v1307_v51 = vrot.slane %v1293_v47, %v3192_v49  ;;  %v1258_v52 = vcombine.low %v1249_v45, %v1257_v48  ;;  %v1259_v53 = vcombine.high %v1249_v45, %v1257_v48 }
 0x571   : > { %v1308_v54 = vcombine.high %v1300_v50, %v2891_v60  ;;  %v1309_v55 = vcombine.high %v1307_v51, %v2891_v60  ;;  %v1266_v58 = vrot.slane %v1258_v52, %v3192_v49  ;;  %v1273_v59 = vrot.slane %v1259_v53, %v3192_v49  ;;  %v2775_v19 = vpop.eup %2774 }
 0x572   : > { %v1315_v61 = vshrl.u32 %v1300_v50, 16  ;;  %v1331_v62 = vshrl.u32 %v1307_v51, 16  ;;  %v1635_v36 = vmul.f32 %v2775_v19, %v3281_v20 }
 0x573   : > { %v1323_v63 = vshrl.u32 %v1308_v54, 16  ;;  %v1274_v0 = vcombine.high %v1266_v58, %v2891_v60  ;;  %v1275_v1 = vcombine.high %v1273_v59, %v2891_v60  ;;  %v1312_v2 = vpack.i.b16 %v1300_v50, %v1266_v58  ;;  %v2777_v25 = vpop.eup %2776 }
 0x574   : > { %v1339_v3 = vshrl.u32 %v1309_v55, 16  ;;  %v1314_v4 = vshrl.u32 %v1266_v58, 16  ;;  %v1328_v5 = vpack.i.b16 %v1307_v51, %v1273_v59  ;;  %v1330_v6 = vshrl.u32 %v1273_v59, 16 }
 0x575   : > { %v1320_v7 = vpack.i.b16 %v1308_v54, %v1274_v0  ;;  %v1322_v8 = vshrl.u32 %v1274_v0, 16  ;;  %v1336_v56 = vpack.i.b16 %v1309_v55, %v1275_v1  ;;  %v1338_v57 = vshrl.u32 %v1275_v1, 16 }
 0x576   : > { %v1316_v9 = vpack.i.b16 %v1315_v61, %v1314_v4  ;;  %v1332_v10 = vpack.i.b16 %v1331_v62, %v1330_v6  ;;  %v1342_v11 = vcombine.low %v1312_v2, %v1328_v5  ;;  %v1636_v39 = vmul.f32 %v2777_v25, %v3285_v23 }
 0x577   : > { %v1324_v12 = vpack.i.b16 %v1323_v63, %v1322_v8  ;;  %v1340_v13 = vpack.i.b16 %v1339_v3, %v1338_v57  ;;  %v1350_v14 = vcombine.low %v1320_v7, %v1336_v56  ;;  %v1639_v47 = vpack.c.bf16 %v1635_v36, %v1635_v36 }
 0x578   : > { %v1367_v15 = vcombine.low %v1316_v9, %v1332_v10  ;;  %v1349_v16 = vrot.slane %v1342_v11, %v3182_v43  ;;  %v1640_v48 = vpack.c.bf16 %v1636_v39, %v1636_v39 }
 0x579   : > { %v1375_v17 = vcombine.low %v1324_v12, %v1340_v13  ;;  %v1357_v18 = vrot.slane %v1350_v14, %v3182_v43 }
 0x57a   : > { %v1374_v33 = vrot.slane %v1367_v15, %v3182_v43 }
 0x57b   : > { %v1358_v21 = vcombine.low %v1349_v16, %v1357_v18  ;;  %v1382_v31 = vrot.slane %v1375_v17, %v3182_v43 }
 0x57d   : > { %v1365_v26 = vrot.slane %v1358_v21, %v3192_v49  ;;  %v1383_v27 = vcombine.low %v1374_v33, %v1382_v31  ;;  %v2758_v33 = vld [vmem:[%s3556_s10] sm:$0xff]  }
 0x57f   : > { %v1390_v28 = vrot.slane %v1383_v27, %v3192_v49  ;;  %v1366_v29 = vcombine.high %v1365_v26, %v2891_v60  ;;  %v1395_v34 = vshrl.u32 %v1365_v26, 16 }
 0x581   : > { %v1394_v35 = vpack.i.b16 %v1390_v28, %v1365_v26  ;;  %v1396_v37 = vshrl.u32 %v1390_v28, 16  ;;  %v1391_v38 = vcombine.high %v1390_v28, %v2891_v60  ;;  %v1401_v40 = vshrl.u32 %v1366_v29, 16 }
 0x583   : > { %v1648_v41 = vsel %vm1646_vm4, %v1394_v35, 0  ;;  %v1397_v42 = vpack.i.b16 %v1396_v37, %v1395_v34  ;;  %v1400_v44 = vpack.i.b16 %v1391_v38, %v1366_v29  ;;  %v1402_v45 = vshrl.u32 %v1391_v38, 16  ;;  %v2759_v34 = vld [vmem:[%s3556_s10 + $0x8] sm:$0xff]  }
 0x584   : > { %2616 = vmatpush3.bf16.msra.mxu1 %v1648_v41 }
 0x585   : > { %v1694_v46 = vsel %vm1646_vm4, %v1397_v42, 0  ;;  %2627 = vmatprep.subr.bf16.mxu1 %v2883_v22  ;;  %v1403_v20 = vpack.i.b16 %v1402_v45, %v1401_v40  ;;  %v1740_v60 = vsel %vm1646_vm4, %v1400_v44, 0 }
 0x586   : > { %2622 = vmatpush3.bf16.msra.mxu0 %v1694_v46 }
 0x587   : > { %2618 = vmatmul.mubr.msk.bf16.vlgmr.msra.gmra.mrb[8].mxu1 %vm1410_vm3, %v1639_v47  ;;  %2633 = vmatprep.subr.bf16.mxu0 %v2883_v22  ;;  %v1786_v23 = vsel %vm1646_vm4, %v1403_v20, 0 }
 0x588   : > { %2628 = vmatpush3.bf16.msra.mxu1 %v1740_v60  ;;  %2629 = vmatprep.mubr.msk.bf16.mxu1 %vm2884_vm1, %v2883_v22 }
 0x589   : > { %2624 = vmatmul.mubr.msk.bf16.vlgmr.msra.gmra.mrb[12].mxu0 %vm1410_vm3, %v1640_v48  ;;  %2639 = vmatprep.subr.bf16.mxu1 %v2883_v22 }
 0x58a   : > { %2634 = vmatpush3.bf16.msra.mxu0 %v1786_v23  ;;  %2635 = vmatprep.mubr.msk.bf16.mxu0 %vm2884_vm1, %v2883_v22 }
 0x58b   : > { %2647 = vmatprep.subr.bf16.mxu0 %v2883_v22 }
 0x59b   : > { %v1630_v50 = vpop.xlane.xlu0 %1629 }
 0x59c   : > { %2778 = vrcp.f32 %v1630_v50 }
 0x59d   : > { %v1627_v51 = vpop.xlane.xlu1 %1626 }
 0x59e   : > { %2780 = vrcp.f32 %v1627_v51 }
 0x5a6   : > { %v2779_v52 = vpop.eup %2778 }
 0x5a7   : > { %v1638_v53 = vmul.f32 %v2779_v52, %v3291_v30 }
 0x5a8   : > { %v2781_v54 = vpop.eup %2780 }
 0x5a9   : > { %v1637_v55 = vmul.f32 %v2781_v54, %v3293_v32  ;;  %v1642_v58 = vpack.c.bf16 %v1638_v53, %v1638_v53 }
 0x5ab   : > { %2636 = vmatmul.mubr.msk.bf16.vlgmr.msra.gmra.mrb[16].mxu0 %vm1410_vm3, %v1642_v58  ;;  %v1641_v59 = vpack.c.bf16 %v1637_v55, %v1637_v55 }
 0x5ac   : > { %2651 = vmatprep.mubr.msk.bf16.mxu0 %vm2884_vm1, %v2883_v22 }
 0x5ad   : > { %2630 = vmatmul.mubr.msk.bf16.vlgmr.msra.gmra.mrb[12].mxu1 %vm1410_vm3, %v1641_v59  ;;  %v2526_v59 = vld [vmem:[%s3557_s0] ss:$0 sm:$0xff] }
 0x5ae   : > { %2643 = vmatprep.mubr.msk.bf16.mxu1 %vm2884_vm1, %v2883_v22  ;;  %2640 = vmatpush3.bf16.msra.mxu1 %v2758_v33 }
 0x5af   : > { %2641 = vmatprep.subr.bf16.mxu1 %v2883_v22 }
 0x5b2   : > { %2642 = vmatpush3.bf16.msra.mxu1 %v2759_v34 }
 0x5b3   : > { %2655 = vmatprep.subr.bf16.mxu1 %v2883_v22 }
 0x65a   : > { %v1684_v61 = vpop.f32.mrb[8].mxu1 }
 0x65b   : > { %v2619_v62 = vpop.f32.mrb[9].mxu1 }
 0x65c   : > { %v1687_v63 = vpop.f32.mrb[10].mxu1  ;;  %v1730_v0 = vpop.f32.mrb[12].mxu0 }
 0x65d   : > { %v2620_v30 = vpop.f32.mrb[11].mxu1  ;;  %v2625_v1 = vpop.f32.mrb[13].mxu0 }
 0x65e   : > { %v1733_v2 = vpop.f32.mrb[14].mxu0 }
 0x65f   : > { %v2626_v32 = vpop.f32.mrb[15].mxu0 }
 0x67e   : > { %v1822_v3 = vpop.f32.mrb[16].mxu0 }
 0x67f   : > { %v1844_v4 = vcombine.low %v1730_v0, %v1822_v3  ;;  %v1845_v5 = vcombine.high %v1730_v0, %v1822_v3  ;;  %v2637_v6 = vpop.f32.mrb[17].mxu0 }
 0x680   : > { %v1776_v7 = vpop.f32.mrb[12].mxu1  ;;  %v1825_v8 = vpop.f32.mrb[18].mxu0 }
 0x681   : > { %v1828_v56 = vcombine.low %v1684_v61, %v1776_v7  ;;  %v1829_v57 = vcombine.high %v1684_v61, %v1776_v7  ;;  %v2631_v9 = vpop.f32.mrb[13].mxu1  ;;  %v2638_v10 = vpop.f32.mrb[19].mxu0  ;;  %v1852_v12 = vrot.slane %v1844_v4, %v3182_v43  ;;  %v1859_v13 = vrot.slane %v1845_v5, %v3182_v43  ;;  %v2760_v7 = vld [vmem:[%s3110_s5] sm:$0xff]   ;;  %v2761_v8 = vld [vmem:[%s3110_s5 + $0x8] sm:$0xff]  }
 0x682   : > { %v1779_v11 = vpop.f32.mrb[14].mxu1  ;;  %2648 = vmatpush3.bf16.msra.mxu0 %v2760_v7 }
 0x683   : > { %v1836_v14 = vrot.slane %v1828_v56, %v3182_v43  ;;  %v1843_v15 = vrot.slane %v1829_v57, %v3182_v43  ;;  %v2632_v16 = vpop.f32.mrb[15].mxu1  ;;  %2649 = vmatprep.subr.bf16.mxu0 %v2883_v22  ;;  %v2763_v56 = vld [vmem:[%s3120_s17 + $0x8] sm:$0xff]  }
 0x685   : > { %v1860_v17 = vcombine.low %v1836_v14, %v1852_v12  ;;  %v1861_v18 = vcombine.high %v1836_v14, %v1852_v12  ;;  %v1876_v19 = vcombine.low %v1843_v15, %v1859_v13  ;;  %v1877_v21 = vcombine.high %v1843_v15, %v1859_v13  ;;  %v2530_v12 = vld [vmem:[%s3559_s1] ss:$0 sm:$0xff] }
 0x686   : > { %2650 = vmatpush3.bf16.msra.mxu0 %v2761_v8  ;;  %v2531_v14 = vld [vmem:[%s3561_s4] ss:$0 sm:$0xff] }
 0x687   : > { %v1868_v31 = vrot.slane %v1860_v17, %v3192_v49  ;;  %v1875_v25 = vrot.slane %v1861_v18, %v3192_v49  ;;  %v1884_v26 = vrot.slane %v1876_v19, %v3192_v49  ;;  %v1891_v27 = vrot.slane %v1877_v21, %v3192_v49  ;;  %v2764_v18 = vld [vmem:[%s3120_s17 + $0x10] sm:$0xff]   ;;  %v2765_v19 = vld [vmem:[%s3120_s17 + $0x18] sm:$0xff]   ;;  %v2532_v21 = vld [vmem:[%s764_s7] ss:$0 sm:$0xff] }
 0x689   : > { %v1896_v28 = vcombine.low %v1868_v31, %v1875_v25  ;;  %v2524_v29 = vcombine.high %v1868_v31, %v1875_v25  ;;  %v1912_v36 = vcombine.low %v1884_v26, %v1891_v27  ;;  %v2525_v35 = vcombine.high %v1884_v26, %v1891_v27 }
 0x68b   : > { %v1903_v37 = vrot.slane %v1896_v28, %v3182_v43  ;;  %v1911_v38 = vrot.slane %v2524_v29, %v3182_v43  ;;  %v1919_v39 = vrot.slane %v1912_v36, %v3182_v43  ;;  %v1927_v40 = vrot.slane %v2525_v35, %v3182_v43 }
 0x68d   : > { %v1929_v41 = vcombine.high %v1903_v37, %v1911_v38  ;;  %v1945_v42 = vcombine.high %v1919_v39, %v1927_v40  ;;  %v1928_v44 = vcombine.low %v1903_v37, %v1911_v38  ;;  %v1944_v45 = vcombine.low %v1919_v39, %v1927_v40 }
 0x68f   : > { %v1943_v46 = vrot.slane %v1929_v41, %v3192_v49  ;;  %v1959_v47 = vrot.slane %v1945_v42, %v3192_v49  ;;  %v1936_v20 = vrot.slane %v1928_v44, %v3192_v49  ;;  %v1952_v60 = vrot.slane %v1944_v45, %v3192_v49 }
 0x691   : > { %v1962_v48 = vcombine.low %v1943_v46, %v1959_v47  ;;  %v1961_v23 = vcombine.high %v1936_v20, %v1952_v60  ;;  %v1963_v50 = vcombine.high %v1943_v46, %v1959_v47  ;;  %v1960_v51 = vcombine.low %v1936_v20, %v1952_v60 }
 0x693   : > { %1969 = vrot.lane.b32.xlu1 %v1962_v48, %s2893_s11  ;;  %1965 = vrot.lane.b32.xlu0 %v1961_v23, %s2894_s16  ;;  %v2542_v23 = vld [vmem:[%s775_s14] ss:$0 sm:$0xff] }
 0x697   : > { %1973 = vrot.lane.b32.xlu1 %v1963_v50, %s2895_s28 }
 0x705   : > { %v1970_v43 = vpop.permute.xlu1 %1969  ;;  %v1966_v52 = vpop.permute.xlu0 %1965 }
 0x706   : > { %v1976_v53 = vsel %vm1410_vm3, %v1960_v51, %v1966_v52  ;;  %v2543_v51 = vld [vmem:[%s778_s9] ss:$0 sm:$0xff] }
 0x707   : > { %v1978_v55 = vsel %vm1977_vm5, %v1976_v53, %v1970_v43 }
 0x709   : > { %v1974_v54 = vpop.permute.xlu1 %1973 }
 0x70a   : > { %v1980_v49 = vsel %vm1979_vm6, %v1978_v55, %v1974_v54 }
 0x70b   : > { %v1981_v58 = vpack.c.bf16 %v1980_v49, %v1980_v49 }
 0x70d   : > { %2644 = vmatmul.mubr.msk.bf16.vlgmr.msra.gmra.mrb[16].mxu1 %vm851_vm2, %v1981_v58 }
 0x70e   : > { %2663 = vmatprep.mubr.msk.bf16.mxu1 %vm2884_vm1, %v2883_v22 }
 0x7e0   : > { %v2042_v61 = vpop.f32.mrb[16].mxu1 }
 0x7e1   : > { %v2043_v62 = vadd.f32 %v2526_v59, %v2042_v61  ;;  %v2645_v63 = vpop.f32.mrb[17].mxu1 }
 0x7e2   : > { %v2045_v0 = vpop.f32.mrb[18].mxu1 }
 0x7e3   : > { %v2646_v30 = vpop.f32.mrb[19].mxu1  ;;  %v2048_v1 = vadd.f32 %v2043_v62, %v3151_v24  ;;  %v2762_v24 = vld [vmem:[%s3120_s17] sm:$0xff]  }
 0x7e4   : > { %2656 = vmatpush3.bf16.msra.mxu1 %v2762_v24 }
 0x7e5   : > { %v2051_v2 = vsel %vm851_vm2, %v2048_v1, 0.0  ;;  %2657 = vmatprep.subr.bf16.mxu1 %v2883_v22 }
 0x7e6   : > { %2052 = vadd.xlane.f32.xlu0 %v2051_v2 }
 0x7e8   : > { %2658 = vmatpush3.bf16.msra.mxu1 %v2763_v56 }
 0x7e9   : > { %2659 = vmatprep.subr.bf16.mxu1 %v2883_v22 }
 0x7ec   : > { %2660 = vmatpush3.bf16.msra.mxu1 %v2764_v18 }
 0x7ed   : > { %2661 = vmatprep.subr.bf16.mxu1 %v2883_v22  ;;  %v2536_v22 = vld [vmem:[%s772_s3] ss:$0 sm:$0xff] }
 0x7f0   : > { %2662 = vmatpush3.bf16.msra.mxu1 %v2765_v19 }
 0x873   : > { %v2053_v32 = vpop.xlane.xlu0 %2052 }
 0x874   : > { %v2055_v3 = vmul.f32 0.03125, %v2053_v32 }
 0x876   : > { %v2056_v4 = vsub.f32 %v2048_v1, %v2055_v3 }
 0x878   : > { %v2057_v5 = vmul.f32 %v2056_v4, %v2056_v4 }
 0x87a   : > { %v2058_v6 = vsel %vm851_vm2, %v2057_v5, 0.0 }
 0x87b   : > { %2059 = vadd.xlane.f32.xlu1 %v2058_v6 }
 0x908   : > { %v2060_v57 = vpop.xlane.xlu1 %2059 }
 0x909   : > { %v2061_v9 = vmul.f32 0.03125, %v2060_v57 }
 0x90b   : > { %v2062_v10 = vadd.f32 1e-05, %v2061_v9 }
 0x90d   : > { %2782 = vrsqrt.f32 %v2062_v10 }
 0x917   : > { %v2783_v11 = vpop.eup %2782 }
 0x918   : > { %v2064_v13 = vmul.f32 %v2783_v11, %v2056_v4 }
 0x91a   : > { %v2071_v15 = vmul.f32 %v2530_v12, %v2064_v13 }
 0x91c   : > { %v2078_v16 = vadd.f32 %v2531_v14, %v2071_v15 }
 0x91e   : > { %v2079_v17 = vpack.c.bf16 %v2078_v16, %v2078_v16 }
 0x920   : > { %2652 = vmatmul.mubr.msk.bf16.vlgmr.msra.gmra.mrb[20].mxu0 %vm851_vm2, %v2079_v17 }
 0x9f3   : > { %v2140_v33 = vpop.f32.mrb[20].mxu0 }
 0x9f4   : > { %v2141_v31 = vadd.f32 %v2532_v21, %v2140_v33  ;;  %v2653_v25 = vpop.f32.mrb[21].mxu0 }
 0x9f5   : > { %v2143_v26 = vpop.f32.mrb[22].mxu0 }
 0x9f6   : > { %v2146_v27 = vmax.f32 %v2141_v31, 0.0  ;;  %v2654_v28 = vpop.f32.mrb[23].mxu0 }
 0x9f8   : > { %v2147_v29 = vpack.c.bf16 %v2146_v27, %v2146_v27 }
 0x9fa   : > { %2664 = vmatmul.mubr.msk.bf16.vlgmr.msra.gmra.mrb[20].mxu1 %vm2187_vm7, %v2147_v29 }
 0xacd   : > { %v2225_v36 = vpop.f32.mrb[20].mxu1 }
 0xace   : > { %v2226_v35 = vadd.f32 %v2536_v22, %v2225_v36  ;;  %v2665_v34 = vpop.f32.mrb[21].mxu1 }
 0xacf   : > { %v2228_v37 = vpop.f32.mrb[22].mxu1 }
 0xad0   : > { %v2666_v38 = vpop.f32.mrb[23].mxu1  ;;  %v2231_v39 = vadd.f32 %v2226_v35, %v2078_v16 }
 0xad2   : > { %v2234_v40 = vsel %vm851_vm2, %v2231_v39, 0.0 }
 0xad3   : > { %2235 = vadd.xlane.f32.xlu0 %v2234_v40 }
 0xb60   : > { %v2236_v41 = vpop.xlane.xlu0 %2235 }
 0xb61   : > { %v2237_v42 = vmul.f32 0.03125, %v2236_v41 }
 0xb63   : > { %v2238_v44 = vsub.f32 %v2231_v39, %v2237_v42 }
 0xb65   : > { %v2239_v45 = vmul.f32 %v2238_v44, %v2238_v44 }
 0xb67   : > { %v2240_v46 = vsel %vm851_vm2, %v2239_v45, 0.0 }
 0xb68   : > { %2241 = vadd.xlane.f32.xlu0 %v2240_v46 }
 0xbf5   : > { %v2242_v47 = vpop.xlane.xlu0 %2241 }
 0xbf6   : > { %v2243_v20 = vmul.f32 0.03125, %v2242_v47 }
 0xbf8   : > { %v2244_v60 = vadd.f32 1e-05, %v2243_v20 }
 0xbfa   : > { %2784 = vrsqrt.f32 %v2244_v60 }
 0xc04   : > { %v2785_v48 = vpop.eup %2784 }
 0xc05   : > { %v2246_v50 = vmul.f32 %v2785_v48, %v2238_v44  ;;  %2265 = sbr.rel (%p2544_p1) target bundleno = 3084 (0xc0c), region = 96 }
 0xc07   : > { %v2253_v43 = vmul.f32 %v2542_v23, %v2246_v50 }
 0xc09   : > { %v2260_v52 = vadd.f32 %v2543_v51, %v2253_v43 }
 0xc0b   : > { %2261 = vst.msk [vmem:[#allocation2] sm:$0xff] %vm851_vm2, %v2260_v52  ;;  %2266 = vst.msk [vmem:[%s723_s19] sm:$0xff] (!%p2544_p1), %vm851_vm2, %v2260_v52 }
 0xc0c PF: > { %s3566_s0 = sld [smem:[#allocation10_spill]]  ;;  %s3567_s14 = sld [smem:[#allocation7_spill]] }
 0xc0d   : > { %s3569_s9 = sld [smem:[#allocation32_spill]]  ;;  %s2281_s25 = sshll.u32 %s723_s19, 4  ;;  %s2282_s25 = int_to_ptr.vmem [resolvable:$true] %s2281_s25 }
 0xc0e   : > { %s2786_s4 = scalar_lea.vmem %s2282_s25, 128  ;;  %s2896_s15 = smov [#allocation3]  }
 0xc0f   : > { %p2787_p2 = scmp.ne.s32.totalorder %s2282_s25, %s2786_s4  ;;  %s2790_s20 = sshll.u32 %s2896_s15, 4  ;;  %s2791_s20 = int_to_ptr.vmem [resolvable:$false] %s2790_s20 }
 0xc10   : > { %s2792_s22 = scalar_lea.vmem %s2791_s20, 256  ;;  %p2793_p6 = scmp.lt.s32.totalorder %s2282_s25, %s2791_s20 }
 0xc11   : > { %p2788_p4 = pnand %p2787_p2, %p3036_p3  ;;  %p2794_p7 = scmp.lt.s32.totalorder %s2792_s22, %s2786_s4 }
 0xc12   : > { %s2546_s18 = sshll.u32 %s3566_s0, 7  ;;  %s3570_s21 = sand.u32 1, %s3567_s14  }
 0xc13   : > { %s3427_s1 = scalar_lea.hbm %s3569_s9, %s2546_s18  ;;  %s2268_s27 = scalar_lea.sflag [#allocation4], %s3570_s21 }
 0xc14   : > { %p2789_p5 = pneg %p2788_p4  ;;  %p2795_p8 = por %p2794_p7, %p2793_p6 }
 0xc16   : > { %p2796_p10 = pnand %p2795_p8, %p2789_p5 }
 0xc18   : > { %2799 = shalt.err (!%p2796_p10)
}
 0xc19   : > { %s2800_s29 = scalar_lea.hbm %s3427_s1, 128  ;;  %s2804_s11 = scalar_lea.hbm %s3569_s9, 256 }
 0xc1a   : > { %p2801_p11 = scmp.ne.s32.totalorder %s3427_s1, %s2800_s29  ;;  %p2805_p0 = scmp.lt.u32.totalorder %s3427_s1, %s3569_s9 }
 0xc1b   : > { %p2806_p1 = scmp.lt.u32.totalorder %s2804_s11, %s2800_s29  ;;  %p2808_p4 = scmp.lt.u32.totalorder %s2800_s29, %s3427_s1 }
 0xc1c   : > { %p2802_p12 = pnand %p2801_p11, %p3036_p3 }
 0xc1d   : > { %p2807_p2 = por %p2806_p1, %p2805_p0 }
 0xc1e   : > { %p2803_p13 = pneg %p2802_p12 }
 0xc1f   : > { %p2809_p5 = por %p2808_p4, %p2807_p2 }
 0xc21   : > { %p2810_p6 = pnand %p2809_p5, %p2803_p13 }
 0xc23   : > { %2813 = shalt.err (!%p2810_p6)
}
 0xc24   : > { %2667 = dma.vmem_to_hbm [thread:$0]  (%p3036_p3), %s2282_s25, 128, %s3427_s1, %s2268_s27  }
 0xc25 PF: > { %s3571_s3 = sld [smem:[#allocation13_spill]]  ;;  %s3572_s16 = sld [smem:[#allocation6_spill]] }
 0xc2b   : > { %p2673_p7 = scmp.ge.s32.totalorder %s3571_s3, 2  ;;  %s2293_s30 = sand.u32 1, %s3572_s16  }
 0xc2c   : > { %s2294_s26 = scalar_lea.sflag [#allocation4], %s2293_s30 }
 0xc2d   : > { %p2670_p8 = pnand %p2673_p7, %p3046_p9 }
 0xc2f   : > { %2847 = dma.done.wait (!%p2670_p8), %s2294_s26, 128  }
 0xc30   : > { %2849 = vsyncadd (!%p2670_p8), %s2294_s26, 4294967168  ;;  %s30_s30 = sadd.s32 1, %s3571_s3   ;;  %s3574_s24 = sld [smem:[#allocation7_spill]] }
 0xc31   : > { %p27_p10 = scmp.ge.s32.totalorder %s30_s30, 6   ;;  %s3575_s25 = sld [smem:[#allocation8_spill]] }
 0xc32   : > { %s3576_s26 = sld [smem:[#allocation18_spill]]  ;;  %s3577_s27 = sld [smem:[#allocation11_spill]] }
 0xc33   : > { %s3578_s28 = sld [smem:[#allocation12_spill]]  ;;  %s3579_s29 = sld [smem:[#allocation14_spill]] }
 0xc34   : > { %s3580_s0 = sld [smem:[#allocation16_spill]]  ;;  %29 = sbr.rel (!%p27_p10) target bundleno = 19 (0x13), region = 173 }
 0xc3b   :  { %2299 = vsyncpa [#allocation4], 1 }
 0xc3c   :  { %2301 = vsyncpa [#allocation4 + $0x1], 1 }

</bundles_post_ra>
